<compile_context>
chip_gen: v5e
topology: v5e:2x2
jax: 0.10.0
libtpu: 0.0.40
codegen_flags: <defaults>
</compile_context>

<pallas_src>
import functools

import jax
import jax.numpy as jnp
from jax.experimental import pallas as pl
from jax.experimental.pallas import tpu as pltpu


def _round_up(n, m):
    return -(-n // m) * m


def _sublane(dtype):
    # Rows per sublane group: 8 for 32-bit, 16 for bf16, 32 for 8-bit dtypes.
    return max(8, 32 // jnp.dtype(dtype).itemsize)


def _vmem_budgets():
    """Generation-aware (pipeline_budget_bytes, vmem_limit_bytes)."""
    cap = 128 * 1024 * 1024
    try:
        cap = int(pltpu.get_tpu_info().vmem_capacity_bytes)
    except Exception:
        pass
    if cap <= 64 * 1024 * 1024:
        # v7x: 64 MiB physical VMEM per TensorCore -> stay well under it.
        return 14 * 1024 * 1024, 36 * 1024 * 1024
    # v5e / v6e: 128 MiB physical; raise the scoped limit so big tiles fit.
    return 28 * 1024 * 1024, 64 * 1024 * 1024


def _pick_row_tile(R, bytes_per_row, sublane, budget):
    """Largest sublane-aligned row tile whose pipeline buffers fit `budget`.

    Byte-based (no fixed row cap) so small-D tensors still move multi-MiB
    tiles per grid step.  Capped at the row count so the tile never exceeds
    the array (partial tail blocks handle the remainder).
    """
    max_rows = max(sublane, budget // max(bytes_per_row, 1))
    row_tile = max((int(max_rows) // sublane) * sublane, sublane)
    if R >= sublane:
        row_tile = min(row_tile, (R // sublane) * sublane)
    return row_tile


# ----------------------------------------------------------------------------
# Standalone LayerNorm kernel (generic PreNorm path: fn applied afterwards).
# ----------------------------------------------------------------------------
def _layernorm_kernel(x_ref, g_ref, b_ref, o_ref, *, eps):
    # x_ref: (TR, D) tile of rows; g_ref/b_ref: (1, D) resident params.
    x = x_ref[...].astype(jnp.float32)
    mean = jnp.mean(x, axis=-1, keepdims=True)
    xc = x - mean
    var = jnp.mean(xc * xc, axis=-1, keepdims=True)          # biased, like torch
    inv = jax.lax.rsqrt(var + eps)
    y = xc * inv * g_ref[...].astype(jnp.float32) + b_ref[...].astype(jnp.float32)
    o_ref[...] = y.astype(o_ref.dtype)


def layernorm_pallas(x2d, gamma, beta, *, eps=1e-5, row_tile=None):
    """x2d: (R, D) rows, normalize over last axis. gamma/beta: (D,)."""
    R, D = x2d.shape
    budget, vmem_limit = _vmem_budgets()
    in_b = jnp.dtype(x2d.dtype).itemsize
    # 2x double-buffered in + 2x double-buffered out + ~3 live f32 copies.
    bytes_per_row = D * (2 * in_b + 2 * in_b + 12)
    sub = _sublane(x2d.dtype)
    if row_tile is None:
        row_tile = _pick_row_tile(R, bytes_per_row, sub, budget)
    grid = pl.cdiv(R, row_tile)

    g2d = gamma.reshape(1, D)
    b2d = beta.reshape(1, D)

    return pl.pallas_call(
        functools.partial(_layernorm_kernel, eps=eps),
        out_shape=jax.ShapeDtypeStruct((R, D), x2d.dtype),
        grid_spec=pltpu.PrefetchScalarGridSpec(
            num_scalar_prefetch=0,
            grid=(grid,),
            in_specs=[
                pl.BlockSpec((row_tile, D), lambda i: (i, 0)),
                pl.BlockSpec((1, D), lambda i: (0, 0)),
                pl.BlockSpec((1, D), lambda i: (0, 0)),
            ],
            out_specs=pl.BlockSpec((row_tile, D), lambda i: (i, 0)),
        ),
        compiler_params=pltpu.CompilerParams(
            dimension_semantics=("parallel",),
            vmem_limit_bytes=vmem_limit,
        ),
    )(x2d, g2d, b2d)


# ----------------------------------------------------------------------------
# Fused LayerNorm + channel linear (for fn == linear over the last axis).
# Avoids the HBM round trip of the normalized activations.
# ----------------------------------------------------------------------------
def _layernorm_matmul_kernel(x_ref, g_ref, b_ref, w_ref, fb_ref, o_ref, *, eps):
    x = x_ref[...].astype(jnp.float32)
    mean = jnp.mean(x, axis=-1, keepdims=True)
    xc = x - mean
    var = jnp.mean(xc * xc, axis=-1, keepdims=True)
    inv = jax.lax.rsqrt(var + eps)
    y = xc * inv * g_ref[...].astype(jnp.float32) + b_ref[...].astype(jnp.float32)
    # Feed the MXU in the weight's dtype (bf16-native on v6e/v7x when w is
    # bf16) with f32 accumulation; never re-cast the resident weight per step.
    acc = jnp.dot(y.astype(w_ref.dtype), w_ref[...],
                  preferred_element_type=jnp.float32)
    o_ref[...] = (acc + fb_ref[...].astype(jnp.float32)).astype(o_ref.dtype)


def prenorm_linear_pallas(x, gamma, beta, w, bias=None, *, eps=1e-5,
                          row_tile=None, col_tile=None):
    """Fused PreNorm + linear: LayerNorm(x) @ w (+ bias). x: (..., D), w: (D, N)."""
    orig_shape = x.shape
    D = orig_shape[-1]
    N = w.shape[1]
    x2d = x.reshape(-1, D)
    R = x2d.shape[0]

    budget, vmem_limit = _vmem_budgets()
    in_b = jnp.dtype(x2d.dtype).itemsize
    out_b = jnp.dtype(x.dtype).itemsize
    w_b = jnp.dtype(w.dtype).itemsize

    # Stream the weight over an inner N axis: bounded VMEM regardless of N
    # (essential on v7x's 64 MiB) and lane-dense output stores.
    if col_tile is None:
        col_tile = N if N <= 512 else 512
    n_col = pl.cdiv(N, col_tile)

    # Per-row: 2x in buffers + ~3 live f32 copies, plus per out column:
    # 2x out buffers + f32 accumulator.  Weight/bias tiles are accounted as a
    # fixed (double-buffered) cost.
    bytes_per_row = D * (2 * in_b + 12) + col_tile * (2 * out_b + 4)
    fixed = 2 * (D * col_tile * w_b + col_tile * 4)
    sub = _sublane(x2d.dtype)
    if row_tile is None:
        row_tile = _pick_row_tile(R, bytes_per_row, sub,
                                  max(budget - fixed, 1 << 20))
    n_row = pl.cdiv(R, row_tile)

    g2d = gamma.reshape(1, D)
    b2d = beta.reshape(1, D)
    if bias is None:
        bias = jnp.zeros((N,), dtype=jnp.float32)
    fb2d = bias.reshape(1, N)

    out = pl.pallas_call(
        functools.partial(_layernorm_matmul_kernel, eps=eps),
        out_shape=jax.ShapeDtypeStruct((R, N), x.dtype),
        grid_spec=pltpu.PrefetchScalarGridSpec(
            num_scalar_prefetch=0,
            grid=(n_row, n_col),
            in_specs=[
                pl.BlockSpec((row_tile, D), lambda i, j: (i, 0)),   # x: const in j
                pl.BlockSpec((1, D), lambda i, j: (0, 0)),          # gamma
                pl.BlockSpec((1, D), lambda i, j: (0, 0)),          # beta
                pl.BlockSpec((D, col_tile), lambda i, j: (0, j)),   # w: streamed
                pl.BlockSpec((1, col_tile), lambda i, j: (0, j)),   # bias
            ],
            out_specs=pl.BlockSpec((row_tile, col_tile), lambda i, j: (i, j)),
        ),
        compiler_params=pltpu.CompilerParams(
            # j is the inner axis so the x row tile is not re-DMA'd per j.
            dimension_semantics=("parallel", "arbitrary"),
            vmem_limit_bytes=vmem_limit,
        ),
    )(x2d, g2d, b2d, w, fb2d)
    return out.reshape(orig_shape[:-1] + (N,))


# ----------------------------------------------------------------------------
# Module wrappers: PreNorm(dim, fn).forward(x) == fn(LayerNorm(x)).
# ----------------------------------------------------------------------------
class ChannelLinear:
    """Linear over the trailing channel axis (stand-in for nn.Linear(dim, n))."""

    def __init__(self, w, bias=None):
        self.w = w            # (D, N)
        self.bias = bias      # (N,) or None

    def __call__(self, y):
        out = jnp.einsum("...d,dn->...n", y, self.w)
        return out if self.bias is None else out + self.bias


class PreNormPallas:
    """JAX/Pallas equivalent of:
        class PreNorm(nn.Module):
            def forward(self, x): return self.fn(self.norm(x))
    `fn` is arbitrary; the LayerNorm hot path runs in a Pallas kernel.  If
    `fn` is a ChannelLinear, LN + matmul are fused in one kernel (no HBM
    round trip of the normalized activations).
    """

    def __init__(self, dim, fn, eps=1e-5, dtype=jnp.float32):
        self.dim = dim
        self.fn = fn
        self.eps = eps
        # nn.LayerNorm(dim) default init: weight=1, bias=0.
        self.gamma = jnp.ones((dim,), dtype=dtype)
        self.beta = jnp.zeros((dim,), dtype=dtype)

    def __call__(self, x):
        D = x.shape[-1]
        assert D == self.dim
        if isinstance(self.fn, ChannelLinear):
            return prenorm_linear_pallas(x, self.gamma, self.beta,
                                         self.fn.w, self.fn.bias, eps=self.eps)
        y2d = layernorm_pallas(x.reshape(-1, D), self.gamma, self.beta,
                               eps=self.eps)
        return self.fn(y2d.reshape(x.shape))


if __name__ == "__main__":
    B, H, W, C = 2, 16, 16, 32   # dim = 32, channels-last

    key = jax.random.PRNGKey(0)
    kx, kw = jax.random.split(key)
    x = jax.random.normal(kx, (B, H, W, C), dtype=jnp.float32)
    # Deterministic example `fn`: a linear (dim -> dim) over the channel axis,
    # standing in for the wrapped axial-attention module.
    w_fn = jax.random.normal(kw, (C, C), dtype=jnp.float32) * 0.02

    def ref_prenorm(xin, w):
        xf = xin.astype(jnp.float32)
        mu = jnp.mean(xf, axis=-1, keepdims=True)
        var = jnp.mean((xf - mu) ** 2, axis=-1, keepdims=True)
        y = (xf - mu) * jax.lax.rsqrt(var + 1e-5)
        return jnp.einsum("...c,cd->...d", y, w)

    # 1) Generic path: Pallas LayerNorm, then `fn` as plain JAX.
    fn_generic = lambda y: jnp.einsum("...c,cd->...d", y, w_fn)
    model = PreNormPallas(C, fn_generic)
    out = jax.block_until_ready(model(x))
    assert jnp.allclose(out, ref_prenorm(x, w_fn), atol=1e-4, rtol=1e-4), \
        "generic mismatch"

    # 2) Auto-dispatched fused LN + channel-linear path.
    model_fused = PreNormPallas(C, ChannelLinear(w_fn))
    out_fused = jax.block_until_ready(model_fused(x))
    assert jnp.allclose(out_fused, ref_prenorm(x, w_fn), atol=1e-4, rtol=1e-4), \
        "fused mismatch"

    # 3) Ragged rows (7x7 spatial -> R = 98, not a tile multiple): handled by
    #    partial last blocks, with no HBM pad/slice copies.
    x_odd = jax.random.normal(jax.random.PRNGKey(1), (2, 7, 7, C),
                              dtype=jnp.float32)
    out_odd = jax.block_until_ready(PreNormPallas(C, fn_generic)(x_odd))
    assert jnp.allclose(out_odd, ref_prenorm(x_odd, w_fn), atol=1e-4, rtol=1e-4), \
        "ragged generic mismatch"
    out_odd_f = jax.block_until_ready(PreNormPallas(C, ChannelLinear(w_fn))(x_odd))
    assert jnp.allclose(out_odd_f, ref_prenorm(x_odd, w_fn), atol=1e-4, rtol=1e-4), \
        "ragged fused mismatch"

    print("KERNEL_OK")
</pallas_src>

<mosaic_0001>
module attributes {stable_mosaic.version = 11 : i64} {
  func.func @_layernorm_kernel(%arg0: i32, %arg1: memref<512x32xf32, #tpu.memory_space<vmem>>, %arg2: memref<1x32xf32, #tpu.memory_space<vmem>>, %arg3: memref<1x32xf32, #tpu.memory_space<vmem>>, %arg4: memref<512x32xf32, #tpu.memory_space<vmem>>) attributes {dimension_semantics = [#tpu.dimension_semantics<parallel>], iteration_bounds = array<i64: 1>, scalar_prefetch = 0 : i64, scratch_operands = 0 : i64, tpu.core_type = #tpu.core_type<tc>, window_params = [{transform_indices = @transform_0, window_bounds = array<i64: 512, 32>}, {pipeline_mode = #tpu.pipeline_mode<synchronous>, transform_indices = @transform_1, window_bounds = array<i64: 1, 32>}, {pipeline_mode = #tpu.pipeline_mode<synchronous>, transform_indices = @transform_2, window_bounds = array<i64: 1, 32>}, {transform_indices = @transform_3, window_bounds = array<i64: 512, 32>}]} {
    %c0 = arith.constant 0 : index
    %c0_0 = arith.constant 0 : index
    %0 = vector.load %arg1[%c0, %c0_0] : memref<512x32xf32, #tpu.memory_space<vmem>>, vector<512x32xf32>
    %cst = arith.constant dense<0.000000e+00> : vector<512xf32>
    %1 = vector.multi_reduction <add>, %0, %cst [1] : vector<512x32xf32> to vector<512xf32>
    %2 = vector.shape_cast %1 : vector<512xf32> to vector<512x1xf32>
    %cst_1 = arith.constant 3.200000e+01 : f32
    %3 = vector.broadcast %cst_1 : f32 to vector<512x1xf32>
    %4 = arith.divf %2, %3 : vector<512x1xf32>
    %5 = vector.broadcast %4 : vector<512x1xf32> to vector<512x32xf32>
    %6 = arith.subf %0, %5 : vector<512x32xf32>
    %7 = arith.mulf %6, %6 : vector<512x32xf32>
    %cst_2 = arith.constant dense<0.000000e+00> : vector<512xf32>
    %8 = vector.multi_reduction <add>, %7, %cst_2 [1] : vector<512x32xf32> to vector<512xf32>
    %9 = vector.shape_cast %8 : vector<512xf32> to vector<512x1xf32>
    %cst_3 = arith.constant 3.200000e+01 : f32
    %10 = vector.broadcast %cst_3 : f32 to vector<512x1xf32>
    %11 = arith.divf %9, %10 : vector<512x1xf32>
    %cst_4 = arith.constant 9.99999974E-6 : f32
    %12 = vector.broadcast %cst_4 : f32 to vector<512x1xf32>
    %13 = arith.addf %11, %12 : vector<512x1xf32>
    %14 = math.rsqrt %13 : vector<512x1xf32>
    %15 = vector.broadcast %14 : vector<512x1xf32> to vector<512x32xf32>
    %16 = arith.mulf %6, %15 : vector<512x32xf32>
    %c0_5 = arith.constant 0 : index
    %c0_6 = arith.constant 0 : index
    %17 = vector.load %arg2[%c0_5, %c0_6] : memref<1x32xf32, #tpu.memory_space<vmem>>, vector<1x32xf32>
    %18 = vector.broadcast %17 : vector<1x32xf32> to vector<512x32xf32>
    %19 = arith.mulf %16, %18 : vector<512x32xf32>
    %c0_7 = arith.constant 0 : index
    %c0_8 = arith.constant 0 : index
    %20 = vector.load %arg3[%c0_7, %c0_8] : memref<1x32xf32, #tpu.memory_space<vmem>>, vector<1x32xf32>
    %21 = vector.broadcast %20 : vector<1x32xf32> to vector<512x32xf32>
    %22 = arith.addf %19, %21 : vector<512x32xf32>
    %c0_9 = arith.constant 0 : index
    %c0_10 = arith.constant 0 : index
    %23 = vector.load %arg4[%c0_9, %c0_10] : memref<512x32xf32, #tpu.memory_space<vmem>>, vector<512x32xf32>
    tpu.vector_store %arg4[%c0_9, %c0_10], %22 {strides = array<i32>} : memref<512x32xf32, #tpu.memory_space<vmem>>, vector<512x32xf32>,
    return
  }
  func.func @transform_0(%arg0: i32) -> (i32, i32) {
    %c0_i32 = arith.constant 0 : i32
    %c0_i32_0 = arith.constant 0 : i32
    return %arg0, %c0_i32 : i32, i32
  }
  func.func @transform_1(%arg0: i32) -> (i32, i32) {
    %c0_i32 = arith.constant 0 : i32
    %c0_i32_0 = arith.constant 0 : i32
    %c0_i32_1 = arith.constant 0 : i32
    return %c0_i32, %c0_i32_0 : i32, i32
  }
  func.func @transform_2(%arg0: i32) -> (i32, i32) {
    %c0_i32 = arith.constant 0 : i32
    %c0_i32_0 = arith.constant 0 : i32
    %c0_i32_1 = arith.constant 0 : i32
    return %c0_i32, %c0_i32_0 : i32, i32
  }
  func.func @transform_3(%arg0: i32) -> (i32, i32) {
    %c0_i32 = arith.constant 0 : i32
    %c0_i32_0 = arith.constant 0 : i32
    return %arg0, %c0_i32 : i32, i32
  }
}

</mosaic_0001>

<bundles_post_ra>
// kernel: tpu_custom_call.1
= control target key start
LH: loop header
LB: loop body
LE: loop exit
PB: predicated region body
PF: predicated region fallthrough
CT: control target
= control target key end

     0   :  { %vm78_vm0 = vcmask 261120   ;;  %s4461_s0 = inlined_call_operand.vmem [shape: f32[512,32], index: 0, kind: input, shape index: {}]   ;;  %s4462_s1 = inlined_call_operand.vmem [shape: f32[1,32], index: 1, kind: input, shape index: {}]   ;;  %s4463_s2 = inlined_call_operand.vmem [shape: f32[1,32], index: 2, kind: input, shape index: {}]   ;;  %s4464_s3 = inlined_call_operand.vmem [shape: f32[512,32], index: 3, kind: output, shape index: {}]  }
   0x1   :  { %v1859_v0 = vld [vmem:[%s4461_s0 + $0x20] sm:$0xff]  ;;  %v1864_v1 = vld [vmem:[%s4461_s0 + $0x10] sm:$0xff]  ;;  %v1880_v6 = vld [vmem:[%s4461_s0 + $0x28] sm:$0xff] }
   0x2   :  { %v1869_v2 = vld [vmem:[%s4461_s0] sm:$0xff]  ;;  %v91_v3 = vsel %vm78_vm0, %v1859_v0, 0.0  ;;  %v85_v4 = vsel %vm78_vm0, %v1864_v1, 0.0  ;;  %v1885_v7 = vld [vmem:[%s4461_s0 + $0x18] sm:$0xff]  ;;  %v1890_v8 = vld [vmem:[%s4461_s0 + $0x8] sm:$0xff]  ;;  %v94_v9 = vsel %vm78_vm0, %v1880_v6, 0.0 }
   0x3   :  { %v79_v5 = vsel %vm78_vm0, %v1869_v2, 0.0  ;;  %92 = vadd.xlane.f32.xlu2 %v91_v3  ;;  %86 = vadd.xlane.f32.xlu1 %v85_v4  ;;  %v88_v10 = vsel %vm78_vm0, %v1885_v7, 0.0  ;;  %v82_v11 = vsel %vm78_vm0, %v1890_v8, 0.0  ;;  %v1901_v12 = vld [vmem:[%s4461_s0 + $0x40] sm:$0xff]  ;;  %v1906_v13 = vld [vmem:[%s4461_s0 + $0x38] sm:$0xff]  ;;  %v1911_v14 = vld [vmem:[%s4461_s0 + $0x30] sm:$0xff] }
   0x4   :  { %80 = vadd.xlane.f32.xlu0 %v79_v5  ;;  %v103_v15 = vsel %vm78_vm0, %v1901_v12, 0.0  ;;  %v100_v16 = vsel %vm78_vm0, %v1906_v13, 0.0  ;;  %v97_v17 = vsel %vm78_vm0, %v1911_v14, 0.0  ;;  %v1922_v18 = vld [vmem:[%s4461_s0 + $0x58] sm:$0xff]  ;;  %v1927_v19 = vld [vmem:[%s4461_s0 + $0x50] sm:$0xff]  ;;  %v1932_v20 = vld [vmem:[%s4461_s0 + $0x48] sm:$0xff] }
   0x5   :  { %v112_v21 = vsel %vm78_vm0, %v1922_v18, 0.0  ;;  %v109_v22 = vsel %vm78_vm0, %v1927_v19, 0.0  ;;  %v106_v23 = vsel %vm78_vm0, %v1932_v20, 0.0  ;;  %v1943_v24 = vld [vmem:[%s4461_s0 + $0x70] sm:$0xff]  ;;  %v1948_v25 = vld [vmem:[%s4461_s0 + $0x68] sm:$0xff]  ;;  %v1953_v26 = vld [vmem:[%s4461_s0 + $0x60] sm:$0xff] }
   0x6   :  { %v121_v27 = vsel %vm78_vm0, %v1943_v24, 0.0  ;;  %v118_v28 = vsel %vm78_vm0, %v1948_v25, 0.0  ;;  %v115_v29 = vsel %vm78_vm0, %v1953_v26, 0.0  ;;  %v1964_v30 = vld [vmem:[%s4461_s0 + $0x88] sm:$0xff]  ;;  %v1969_v31 = vld [vmem:[%s4461_s0 + $0x80] sm:$0xff]  ;;  %v1974_v32 = vld [vmem:[%s4461_s0 + $0x78] sm:$0xff] }
   0x7   :  { %v130_v33 = vsel %vm78_vm0, %v1964_v30, 0.0  ;;  %v127_v34 = vsel %vm78_vm0, %v1969_v31, 0.0  ;;  %v124_v35 = vsel %vm78_vm0, %v1974_v32, 0.0  ;;  %v1985_v36 = vld [vmem:[%s4461_s0 + $0xa0] sm:$0xff]  ;;  %v1990_v37 = vld [vmem:[%s4461_s0 + $0x98] sm:$0xff]  ;;  %v1995_v38 = vld [vmem:[%s4461_s0 + $0x90] sm:$0xff] }
   0x8   :  { %v139_v39 = vsel %vm78_vm0, %v1985_v36, 0.0  ;;  %v136_v40 = vsel %vm78_vm0, %v1990_v37, 0.0  ;;  %v133_v41 = vsel %vm78_vm0, %v1995_v38, 0.0  ;;  %v2006_v42 = vld [vmem:[%s4461_s0 + $0xb8] sm:$0xff]  ;;  %v2011_v43 = vld [vmem:[%s4461_s0 + $0xb0] sm:$0xff]  ;;  %v2016_v44 = vld [vmem:[%s4461_s0 + $0xa8] sm:$0xff] }
   0x9   :  { %v148_v45 = vsel %vm78_vm0, %v2006_v42, 0.0  ;;  %v145_v46 = vsel %vm78_vm0, %v2011_v43, 0.0  ;;  %v142_v47 = vsel %vm78_vm0, %v2016_v44, 0.0  ;;  %v2027_v48 = vld [vmem:[%s4461_s0 + $0xd0] sm:$0xff]  ;;  %v2032_v49 = vld [vmem:[%s4461_s0 + $0xc8] sm:$0xff]  ;;  %v2037_v50 = vld [vmem:[%s4461_s0 + $0xc0] sm:$0xff] }
   0xa   :  { %v157_v51 = vsel %vm78_vm0, %v2027_v48, 0.0  ;;  %v154_v52 = vsel %vm78_vm0, %v2032_v49, 0.0  ;;  %v151_v53 = vsel %vm78_vm0, %v2037_v50, 0.0  ;;  %v2048_v54 = vld [vmem:[%s4461_s0 + $0xe8] sm:$0xff]  ;;  %v2053_v55 = vld [vmem:[%s4461_s0 + $0xe0] sm:$0xff]  ;;  %v2058_v56 = vld [vmem:[%s4461_s0 + $0xd8] sm:$0xff] }
   0xb   :  { %95 = vadd.xlane.f32.xlu2 %v94_v9  ;;  %89 = vadd.xlane.f32.xlu1 %v88_v10  ;;  %v166_v57 = vsel %vm78_vm0, %v2048_v54, 0.0  ;;  %v163_v58 = vsel %vm78_vm0, %v2053_v55, 0.0  ;;  %v160_v59 = vsel %vm78_vm0, %v2058_v56, 0.0  ;;  %v2069_v60 = vld [vmem:[%s4461_s0 + $0x100] sm:$0xff]  ;;  %v2074_v61 = vld [vmem:[%s4461_s0 + $0xf8] sm:$0xff]  ;;  %v2079_v62 = vld [vmem:[%s4461_s0 + $0xf0] sm:$0xff] }
   0xc   :  { %83 = vadd.xlane.f32.xlu0 %v82_v11  ;;  %v175_v63 = vsel %vm78_vm0, %v2069_v60, 0.0  ;;  %v172_v3 = vsel %vm78_vm0, %v2074_v61, 0.0  ;;  %v169_v4 = vsel %vm78_vm0, %v2079_v62, 0.0  ;;  %v2090_v5 = vld [vmem:[%s4461_s0 + $0x118] sm:$0xff]  ;;  %v2095_v9 = vld [vmem:[%s4461_s0 + $0x110] sm:$0xff]  ;;  %v2100_v10 = vld [vmem:[%s4461_s0 + $0x108] sm:$0xff] }
   0xd   :  { %4534 = vst [vmem:[#allocation2_spill] sm:$0xff] %v2090_v5  ;;  %v184_v11 = vsel %vm78_vm0, %v2090_v5, 0.0 }
  0x13   :  { %104 = vadd.xlane.f32.xlu2 %v103_v15  ;;  %101 = vadd.xlane.f32.xlu1 %v100_v16  ;;  %v181_v15 = vsel %vm78_vm0, %v2095_v9, 0.0  ;;  %v178_v16 = vsel %vm78_vm0, %v2100_v10, 0.0 }
  0x14   :  { %98 = vadd.xlane.f32.xlu0 %v97_v17  ;;  %v2111_v17 = vld [vmem:[%s4461_s0 + $0x130] sm:$0xff] }
  0x15   :  { %4535 = vst [vmem:[#allocation3_spill] sm:$0xff] %v2111_v17 }
  0x1b   :  { %113 = vadd.xlane.f32.xlu2 %v112_v21  ;;  %110 = vadd.xlane.f32.xlu1 %v109_v22  ;;  %v2116_v21 = vld [vmem:[%s4461_s0 + $0x128] sm:$0xff]  ;;  %v2121_v22 = vld [vmem:[%s4461_s0 + $0x120] sm:$0xff] }
  0x1c   :  { %107 = vadd.xlane.f32.xlu0 %v106_v23  ;;  %4536 = vst [vmem:[#allocation4_spill] sm:$0xff] %v2116_v21  ;;  %v193_v23 = vsel %vm78_vm0, %v2111_v17, 0.0 }
  0x1d   :  { %4537 = vst [vmem:[#allocation5_spill] sm:$0xff] %v2121_v22 }
  0x23   :  { %122 = vadd.xlane.f32.xlu2 %v121_v27  ;;  %119 = vadd.xlane.f32.xlu1 %v118_v28  ;;  %v190_v27 = vsel %vm78_vm0, %v2116_v21, 0.0  ;;  %v187_v28 = vsel %vm78_vm0, %v2121_v22, 0.0 }
  0x24   :  { %116 = vadd.xlane.f32.xlu0 %v115_v29  ;;  %v2132_v29 = vld [vmem:[%s4461_s0 + $0x148] sm:$0xff] }
  0x25   :  { %4538 = vst [vmem:[#allocation6_spill] sm:$0xff] %v2132_v29 }
  0x2b   :  { %131 = vadd.xlane.f32.xlu2 %v130_v33  ;;  %128 = vadd.xlane.f32.xlu1 %v127_v34  ;;  %v2137_v33 = vld [vmem:[%s4461_s0 + $0x140] sm:$0xff]  ;;  %v2142_v34 = vld [vmem:[%s4461_s0 + $0x138] sm:$0xff] }
  0x2c   :  { %125 = vadd.xlane.f32.xlu0 %v124_v35  ;;  %4539 = vst [vmem:[#allocation7_spill] sm:$0xff] %v2137_v33  ;;  %v202_v35 = vsel %vm78_vm0, %v2132_v29, 0.0 }
  0x2d   :  { %4540 = vst [vmem:[#allocation8_spill] sm:$0xff] %v2142_v34 }
  0x33   :  { %140 = vadd.xlane.f32.xlu2 %v139_v39  ;;  %137 = vadd.xlane.f32.xlu1 %v136_v40  ;;  %v199_v39 = vsel %vm78_vm0, %v2137_v33, 0.0  ;;  %v196_v40 = vsel %vm78_vm0, %v2142_v34, 0.0 }
  0x34   :  { %134 = vadd.xlane.f32.xlu0 %v133_v41  ;;  %v2153_v41 = vld [vmem:[%s4461_s0 + $0x160] sm:$0xff] }
  0x35   :  { %4541 = vst [vmem:[#allocation9_spill] sm:$0xff] %v2153_v41 }
  0x3b   :  { %149 = vadd.xlane.f32.xlu2 %v148_v45  ;;  %146 = vadd.xlane.f32.xlu1 %v145_v46  ;;  %v2158_v45 = vld [vmem:[%s4461_s0 + $0x158] sm:$0xff]  ;;  %v2163_v46 = vld [vmem:[%s4461_s0 + $0x150] sm:$0xff] }
  0x3c   :  { %143 = vadd.xlane.f32.xlu0 %v142_v47  ;;  %4542 = vst [vmem:[#allocation10_spill] sm:$0xff] %v2158_v45  ;;  %v211_v47 = vsel %vm78_vm0, %v2153_v41, 0.0 }
  0x3d   :  { %4543 = vst [vmem:[#allocation11_spill] sm:$0xff] %v2163_v46 }
  0x43   :  { %158 = vadd.xlane.f32.xlu2 %v157_v51  ;;  %155 = vadd.xlane.f32.xlu1 %v154_v52  ;;  %v208_v51 = vsel %vm78_vm0, %v2158_v45, 0.0  ;;  %v205_v52 = vsel %vm78_vm0, %v2163_v46, 0.0  ;;  %v2280_v45 = vld [vmem:[%s4461_s0 + $0x1d8] sm:$0xff] }
  0x44   :  { %152 = vadd.xlane.f32.xlu0 %v151_v53  ;;  %v2174_v53 = vld [vmem:[%s4461_s0 + $0x178] sm:$0xff]  ;;  %4556 = vst [vmem:[#allocation24_spill] sm:$0xff] %v2280_v45 }
  0x45   :  { %4544 = vst [vmem:[#allocation12_spill] sm:$0xff] %v2174_v53 }
  0x4b   :  { %167 = vadd.xlane.f32.xlu2 %v166_v57  ;;  %164 = vadd.xlane.f32.xlu1 %v163_v58  ;;  %v2179_v57 = vld [vmem:[%s4461_s0 + $0x170] sm:$0xff] }
  0x4c   :  { %161 = vadd.xlane.f32.xlu0 %v160_v59  ;;  %4545 = vst [vmem:[#allocation13_spill] sm:$0xff] %v2179_v57 }
  0x53   :  { %176 = vadd.xlane.f32.xlu2 %v175_v63  ;;  %173 = vadd.xlane.f32.xlu1 %v172_v3  ;;  %v2188_v63 = vld [vmem:[%s4461_s0 + $0x168] sm:$0xff] }
  0x54   :  { %170 = vadd.xlane.f32.xlu0 %v169_v4  ;;  %4546 = vst [vmem:[#allocation14_spill] sm:$0xff] %v2188_v63  ;;  %v220_v4 = vsel %vm78_vm0, %v2174_v53, 0.0  ;;  %v2253_v53 = vld [vmem:[%s4461_s0 + $0x1c0] sm:$0xff] }
  0x55   :  { %4553 = vst [vmem:[#allocation21_spill] sm:$0xff] %v2253_v53 }
  0x5b   :  { %185 = vadd.xlane.f32.xlu2 %v184_v11  ;;  %182 = vadd.xlane.f32.xlu1 %v181_v15  ;;  %v217_v11 = vsel %vm78_vm0, %v2179_v57, 0.0  ;;  %v214_v15 = vsel %vm78_vm0, %v2188_v63, 0.0  ;;  %v2258_v57 = vld [vmem:[%s4461_s0 + $0x1b8] sm:$0xff] }
  0x5c   :  { %179 = vadd.xlane.f32.xlu0 %v178_v16  ;;  %v2201_v16 = vld [vmem:[%s4461_s0 + $0x190] sm:$0xff]  ;;  %4554 = vst [vmem:[#allocation22_spill] sm:$0xff] %v2258_v57  ;;  %v244_v41 = vsel %vm78_vm0, %v2258_v57, 0.0 }
  0x5d   :  { %4547 = vst [vmem:[#allocation15_spill] sm:$0xff] %v2201_v16 }
  0x63   :  { %194 = vadd.xlane.f32.xlu2 %v193_v23  ;;  %191 = vadd.xlane.f32.xlu1 %v190_v27  ;;  %v2206_v23 = vld [vmem:[%s4461_s0 + $0x188] sm:$0xff] }
  0x64   :  { %188 = vadd.xlane.f32.xlu0 %v187_v28  ;;  %4548 = vst [vmem:[#allocation16_spill] sm:$0xff] %v2206_v23 }
  0x6b   :  { %203 = vadd.xlane.f32.xlu2 %v202_v35  ;;  %200 = vadd.xlane.f32.xlu1 %v199_v39  ;;  %v2215_v35 = vld [vmem:[%s4461_s0 + $0x180] sm:$0xff] }
  0x6c   :  { %197 = vadd.xlane.f32.xlu0 %v196_v40  ;;  %4549 = vst [vmem:[#allocation17_spill] sm:$0xff] %v2215_v35  ;;  %v229_v40 = vsel %vm78_vm0, %v2201_v16, 0.0 }
  0x73   :  { %212 = vadd.xlane.f32.xlu2 %v211_v47  ;;  %209 = vadd.xlane.f32.xlu1 %v208_v51  ;;  %v226_v47 = vsel %vm78_vm0, %v2206_v23, 0.0  ;;  %v223_v51 = vsel %vm78_vm0, %v2215_v35, 0.0 }
  0x74   :  { %206 = vadd.xlane.f32.xlu0 %v205_v52  ;;  %v1835_v52 = vmov 32.0  }
  0x75   :  { %1701 = vrcp.f32 %v1835_v52 }
  0x76   :  { %v2181_v58 = vpop.xlane.xlu2 %92  ;;  %v2183_v59 = vpop.xlane.xlu1 %86 }
  0x77   :  { %v2190_v3 = vpop.xlane.xlu0 %80 }
  0x7b   :  { %221 = vadd.xlane.f32.xlu2 %v220_v4  ;;  %218 = vadd.xlane.f32.xlu1 %v217_v11  ;;  %v2226_v4 = vld [vmem:[%s4461_s0 + $0x1a8] sm:$0xff]  ;;  %v2231_v11 = vld [vmem:[%s4461_s0 + $0x1a0] sm:$0xff] }
  0x7c   :  { %215 = vadd.xlane.f32.xlu0 %v214_v15  ;;  %4550 = vst [vmem:[#allocation18_spill] sm:$0xff] %v2226_v4  ;;  %v238_v52 = vsel %vm78_vm0, %v2226_v4, 0.0  ;;  %v235_v35 = vsel %vm78_vm0, %v2231_v11, 0.0 }
  0x7d   :  { %4551 = vst [vmem:[#allocation19_spill] sm:$0xff] %v2231_v11 }
  0x7e   :  { %v2208_v27 = vpop.xlane.xlu2 %95  ;;  %v2210_v28 = vpop.xlane.xlu1 %89 }
  0x7f   :  { %v84_v39 = vpop.xlane.xlu0 %83 }
  0x83   :  { %230 = vadd.xlane.f32.xlu2 %v229_v40  ;;  %227 = vadd.xlane.f32.xlu1 %v226_v47  ;;  %v2240_v40 = vld [vmem:[%s4461_s0 + $0x198] sm:$0xff] }
  0x84   :  { %224 = vadd.xlane.f32.xlu0 %v223_v51  ;;  %4552 = vst [vmem:[#allocation20_spill] sm:$0xff] %v2240_v40  ;;  %v1702_v51 = vpop.eup %1701  ;;  %v232_v23 = vsel %vm78_vm0, %v2240_v40, 0.0  ;;  %v247_v40 = vsel %vm78_vm0, %v2253_v53, 0.0 }
  0x85   :  { %v272_v63 = vmul.f32 32.0, %v1702_v51  ;;  %vm276_vm1 = vweird.f32 %v1702_v51 }
  0x86   :  { %v2233_v15 = vpop.xlane.xlu2 %104  ;;  %v2235_v16 = vpop.xlane.xlu1 %101 }
  0x87   :  { %v2242_v47 = vpop.xlane.xlu0 %98 }
  0x8b   :  { %239 = vadd.xlane.f32.xlu2 %v238_v52  ;;  %236 = vadd.xlane.f32.xlu1 %v235_v35  ;;  %v2267_v52 = vld [vmem:[%s4461_s0 + $0x1b0] sm:$0xff] }
  0x8c   :  { %233 = vadd.xlane.f32.xlu0 %v232_v23  ;;  %4555 = vst [vmem:[#allocation23_spill] sm:$0xff] %v2267_v52  ;;  %v273_v23 = vsub.f32 1.0, %v272_v63  ;;  %v241_v29 = vsel %vm78_vm0, %v2267_v52, 0.0  ;;  %v2285_v63 = vld [vmem:[%s4461_s0 + $0x1d0] sm:$0xff] }
  0x8d   :  { %4557 = vst [vmem:[#allocation25_spill] sm:$0xff] %v2285_v63  ;;  %v253_v52 = vsel %vm78_vm0, %v2285_v63, 0.0 }
  0x8e   :  { %v2260_v4 = vpop.xlane.xlu2 %113  ;;  %v2262_v11 = vpop.xlane.xlu1 %110  ;;  %v274_v46 = vmul.f32 %v1702_v51, %v273_v23  ;;  %v256_v23 = vsel %vm78_vm0, %v2280_v45, 0.0  ;;  %v2314_v45 = vld [vmem:[%s4461_s0 + $0x1e8] sm:$0xff] }
  0x8f   :  { %v2269_v35 = vpop.xlane.xlu0 %107  ;;  %4560 = vst [vmem:[#allocation28_spill] sm:$0xff] %v2314_v45  ;;  %v262_v33 = vsel %vm78_vm0, %v2314_v45, 0.0 }
  0x93   :  { %248 = vadd.xlane.f32.xlu2 %v247_v40  ;;  %245 = vadd.xlane.f32.xlu1 %v244_v41  ;;  %v2294_v40 = vld [vmem:[%s4461_s0 + $0x1c8] sm:$0xff] }
  0x94   :  { %242 = vadd.xlane.f32.xlu0 %v241_v29  ;;  %4558 = vst [vmem:[#allocation26_spill] sm:$0xff] %v2294_v40  ;;  %v275_v29 = vadd.f32 %v1702_v51, %v274_v46  ;;  %v250_v17 = vsel %vm78_vm0, %v2294_v40, 0.0  ;;  %v2309_v46 = vld [vmem:[%s4461_s0 + $0x1f0] sm:$0xff] }
  0x95   :  { %4559 = vst [vmem:[#allocation27_spill] sm:$0xff] %v2309_v46 }
  0x96   :  { %v2287_v53 = vpop.xlane.xlu2 %122  ;;  %v2289_v57 = vpop.xlane.xlu1 %119  ;;  %v2304_v34 = vsel %vm276_vm1, %v1702_v51, %v275_v29 }
  0x97   :  { %v2296_v41 = vpop.xlane.xlu0 %116  ;;  %v278_v63 = vmul.f32 %v2304_v34, %v2190_v3  ;;  %v279_v40 = vmul.f32 %v2304_v34, %v84_v39  ;;  %v282_v22 = vmul.f32 %v2304_v34, %v2181_v58  ;;  %v280_v58 = vmul.f32 %v2304_v34, %v2183_v59 }
  0x98   :  { %v285_v59 = vmul.f32 %v2304_v34, %v2235_v16 }
  0x99   :  { %v2337_v39 = vsub.f32 %v1869_v2, %v278_v63  ;;  %v2340_v5 = vsub.f32 %v1890_v8, %v279_v40  ;;  %v2353_v2 = vld [vmem:[%s4461_s0 + $0x1f8] sm:$0xff]  ;;  %v2366_v40 = vsub.f32 %v1859_v0, %v282_v22  ;;  %v284_v0 = vmul.f32 %v2304_v34, %v2242_v47 }
  0x9a   :  { %v2395_v47 = vsub.f32 %v1906_v13, %v285_v59  ;;  %v287_v13 = vmul.f32 %v2304_v34, %v2269_v35 }
  0x9b   :  { %257 = vadd.xlane.f32.xlu2 %v256_v23  ;;  %254 = vadd.xlane.f32.xlu1 %v253_v52  ;;  %v265_v23 = vsel %vm78_vm0, %v2309_v46, 0.0  ;;  %4561 = vst [vmem:[#allocation29_spill] sm:$0xff] %v2337_v39  ;;  %v281_v46 = vmul.f32 %v2304_v34, %v2210_v28  ;;  %v406_v8 = vmul.f32 %v2337_v39, %v2337_v39  ;;  %v268_v28 = vsel %vm78_vm0, %v2353_v2, 0.0 }
  0x9c   :  { %251 = vadd.xlane.f32.xlu0 %v250_v17  ;;  %v2326_v17 = vld [vmem:[%s4461_s0 + $0x1e0] sm:$0xff]  ;;  %4562 = vst [vmem:[#allocation30_spill] sm:$0xff] %v2340_v5 }
  0x9d   :  { %v259_v3 = vsel %vm78_vm0, %v2326_v17, 0.0 }
  0x9e   :  { %v2319_v51 = vpop.xlane.xlu2 %131  ;;  %v2321_v29 = vpop.xlane.xlu1 %128 }
  0x9f   :  { %v2328_v52 = vpop.xlane.xlu0 %125 }
  0xa3   :  { %266 = vadd.xlane.f32.xlu2 %v265_v23  ;;  %263 = vadd.xlane.f32.xlu1 %v262_v33  ;;  %v407_v33 = vmul.f32 %v2340_v5, %v2340_v5  ;;  %v2369_v23 = vsub.f32 %v1885_v7, %v281_v46  ;;  %v2374_v5 = vsub.f32 %v1864_v1, %v280_v58 }
  0xa4   :  { %260 = vadd.xlane.f32.xlu0 %v259_v3  ;;  %v470_v3 = vsel %vm78_vm0, %v406_v8, 0.0  ;;  %v410_v1 = vmul.f32 %v2366_v40, %v2366_v40 }
  0xa5   :  { %v473_v39 = vsel %vm78_vm0, %v407_v33, 0.0  ;;  %4563 = vst [vmem:[#allocation31_spill] sm:$0xff] %v2374_v5  ;;  %v409_v46 = vmul.f32 %v2369_v23, %v2369_v23  ;;  %v408_v16 = vmul.f32 %v2374_v5, %v2374_v5  ;;  %v2398_v33 = vsub.f32 %v1911_v14, %v284_v0 }
  0xa6   :  { %v2346_v21 = vpop.xlane.xlu2 %140  ;;  %v2348_v45 = vpop.xlane.xlu1 %137  ;;  %v288_v5 = vmul.f32 %v2304_v34, %v2262_v11  ;;  %v413_v0 = vmul.f32 %v2395_v47, %v2395_v47 }
  0xa7   :  { %v2361_v63 = vpop.xlane.xlu0 %134  ;;  %v479_v58 = vsel %vm78_vm0, %v409_v46, 0.0  ;;  %v286_v46 = vmul.f32 %v2304_v34, %v2233_v15 }
  0xa8   :  { %v2425_v35 = vsub.f32 %v1927_v19, %v288_v5  ;;  %v290_v19 = vmul.f32 %v2304_v34, %v2296_v41 }
  0xab   :  { %471 = vadd.xlane.f32.xlu1 %v470_v3  ;;  %474 = vadd.xlane.f32.xlu2 %v473_v39  ;;  %v283_v39 = vmul.f32 %v2304_v34, %v2208_v27  ;;  %v476_v27 = vsel %vm78_vm0, %v408_v16, 0.0  ;;  %v491_v16 = vsel %vm78_vm0, %v413_v0, 0.0  ;;  %v289_v0 = vmul.f32 %v2304_v34, %v2260_v4 }
  0xac   :  { %269 = vadd.xlane.f32.xlu0 %v268_v28  ;;  %v482_v28 = vsel %vm78_vm0, %v410_v1, 0.0 }
  0xad   :  { %v2403_v3 = vsub.f32 %v1880_v6, %v283_v39  ;;  %v412_v6 = vmul.f32 %v2398_v33, %v2398_v33  ;;  %v2428_v39 = vsub.f32 %v1932_v20, %v287_v13  ;;  %v416_v13 = vmul.f32 %v2425_v35, %v2425_v35 }
  0xae   :  { %v2380_v22 = vpop.xlane.xlu2 %149  ;;  %v2382_v7 = vpop.xlane.xlu1 %146 }
  0xaf   :  { %v2390_v8 = vpop.xlane.xlu0 %143  ;;  %v411_v11 = vmul.f32 %v2403_v3, %v2403_v3 }
  0xb1   :  { %v485_v15 = vsel %vm78_vm0, %v411_v11, 0.0  ;;  %v500_v11 = vsel %vm78_vm0, %v416_v13, 0.0  ;;  %v292_v13 = vmul.f32 %v2304_v34, %v2287_v53 }
  0xb3   :  { %480 = vadd.xlane.f32.xlu1 %v479_v58  ;;  %483 = vadd.xlane.f32.xlu2 %v482_v28  ;;  %v488_v58 = vsel %vm78_vm0, %v412_v6, 0.0  ;;  %v2433_v28 = vsub.f32 %v1901_v12, %v286_v46  ;;  %v415_v12 = vmul.f32 %v2428_v39, %v2428_v39  ;;  %v2458_v46 = vsub.f32 %v1953_v26, %v290_v19 }
  0xb4   :  { %477 = vadd.xlane.f32.xlu0 %v476_v27  ;;  %v291_v27 = vmul.f32 %v2304_v34, %v2289_v57 }
  0xb5   :  { %v414_v57 = vmul.f32 %v2433_v28, %v2433_v28 }
  0xb6   :  { %v2410_v14 = vpop.xlane.xlu2 %158  ;;  %v2412_v59 = vpop.xlane.xlu1 %155  ;;  %v2455_v41 = vsub.f32 %v1948_v25, %v291_v27  ;;  %v293_v25 = vmul.f32 %v2304_v34, %v2328_v52 }
  0xb7   :  { %v2420_v1 = vpop.xlane.xlu0 %152  ;;  %v494_v4 = vsel %vm78_vm0, %v414_v57, 0.0 }
  0xb8   :  { %v419_v19 = vmul.f32 %v2455_v41, %v2455_v41 }
  0xba   :  { %v509_v57 = vsel %vm78_vm0, %v419_v19, 0.0  ;;  %v295_v19 = vmul.f32 %v2304_v34, %v2319_v51 }
  0xbb   :  { %492 = vadd.xlane.f32.xlu2 %v491_v16  ;;  %489 = vadd.xlane.f32.xlu1 %v488_v58  ;;  %v497_v16 = vsel %vm78_vm0, %v415_v12, 0.0  ;;  %v2463_v58 = vsub.f32 %v1922_v18, %v289_v0  ;;  %v418_v18 = vmul.f32 %v2458_v46, %v2458_v46  ;;  %v2488_v0 = vsub.f32 %v1974_v32, %v293_v25 }
  0xbc   :  { %486 = vadd.xlane.f32.xlu0 %v485_v15  ;;  %v294_v15 = vmul.f32 %v2304_v34, %v2321_v29 }
  0xbd   :  { %v417_v29 = vmul.f32 %v2463_v58, %v2463_v58 }
  0xbe   :  { %v2440_v20 = vpop.xlane.xlu2 %167  ;;  %v2442_v5 = vpop.xlane.xlu1 %164  ;;  %v2485_v52 = vsub.f32 %v1969_v31, %v294_v15  ;;  %v296_v31 = vmul.f32 %v2304_v34, %v2361_v63 }
  0xbf   :  { %v2450_v6 = vpop.xlane.xlu0 %161  ;;  %v503_v53 = vsel %vm78_vm0, %v417_v29, 0.0 }
  0xc0   :  { %v422_v25 = vmul.f32 %v2485_v52, %v2485_v52 }
  0xc2   :  { %v518_v29 = vsel %vm78_vm0, %v422_v25, 0.0  ;;  %v298_v25 = vmul.f32 %v2304_v34, %v2346_v21 }
  0xc3   :  { %501 = vadd.xlane.f32.xlu2 %v500_v11  ;;  %498 = vadd.xlane.f32.xlu1 %v497_v16  ;;  %v506_v11 = vsel %vm78_vm0, %v418_v18, 0.0  ;;  %v2493_v16 = vsub.f32 %v1943_v24, %v292_v13  ;;  %v421_v24 = vmul.f32 %v2488_v0, %v2488_v0  ;;  %v2518_v13 = vsub.f32 %v1995_v38, %v296_v31 }
  0xc4   :  { %495 = vadd.xlane.f32.xlu0 %v494_v4  ;;  %v297_v4 = vmul.f32 %v2304_v34, %v2348_v45 }
  0xc5   :  { %v420_v45 = vmul.f32 %v2493_v16, %v2493_v16 }
  0xc6   :  { %v2470_v26 = vpop.xlane.xlu2 %176  ;;  %v2472_v27 = vpop.xlane.xlu1 %173  ;;  %v2515_v63 = vsub.f32 %v1990_v37, %v297_v4  ;;  %v299_v37 = vmul.f32 %v2304_v34, %v2390_v8 }
  0xc7   :  { %v2480_v12 = vpop.xlane.xlu0 %170  ;;  %v512_v51 = vsel %vm78_vm0, %v420_v45, 0.0 }
  0xc8   :  { %v425_v31 = vmul.f32 %v2515_v63, %v2515_v63 }
  0xca   :  { %v527_v45 = vsel %vm78_vm0, %v425_v31, 0.0  ;;  %v301_v31 = vmul.f32 %v2304_v34, %v2380_v22 }
  0xcb   :  { %510 = vadd.xlane.f32.xlu2 %v509_v57  ;;  %507 = vadd.xlane.f32.xlu1 %v506_v11  ;;  %v515_v57 = vsel %vm78_vm0, %v421_v24, 0.0  ;;  %v2523_v11 = vsub.f32 %v1964_v30, %v295_v19  ;;  %v424_v30 = vmul.f32 %v2518_v13, %v2518_v13  ;;  %v2548_v19 = vsub.f32 %v2016_v44, %v299_v37 }
  0xcc   :  { %504 = vadd.xlane.f32.xlu0 %v503_v53  ;;  %v300_v53 = vmul.f32 %v2304_v34, %v2382_v7 }
  0xcd   :  { %v423_v7 = vmul.f32 %v2523_v11, %v2523_v11 }
  0xce   :  { %v2500_v32 = vpop.xlane.xlu2 %185  ;;  %v2502_v15 = vpop.xlane.xlu1 %182  ;;  %v2545_v8 = vsub.f32 %v2011_v43, %v300_v53  ;;  %v302_v43 = vmul.f32 %v2304_v34, %v2420_v1 }
  0xcf   :  { %v2510_v18 = vpop.xlane.xlu0 %179  ;;  %v521_v21 = vsel %vm78_vm0, %v423_v7, 0.0 }
  0xd0   :  { %v428_v37 = vmul.f32 %v2545_v8, %v2545_v8 }
  0xd2   :  { %v536_v7 = vsel %vm78_vm0, %v428_v37, 0.0  ;;  %v304_v37 = vmul.f32 %v2304_v34, %v2410_v14 }
  0xd3   :  { %519 = vadd.xlane.f32.xlu2 %v518_v29  ;;  %516 = vadd.xlane.f32.xlu1 %v515_v57  ;;  %v524_v29 = vsel %vm78_vm0, %v424_v30, 0.0  ;;  %v2553_v57 = vsub.f32 %v1985_v36, %v298_v25  ;;  %v427_v36 = vmul.f32 %v2548_v19, %v2548_v19  ;;  %v2578_v25 = vsub.f32 %v2037_v50, %v302_v43 }
  0xd4   :  { %513 = vadd.xlane.f32.xlu0 %v512_v51  ;;  %v303_v51 = vmul.f32 %v2304_v34, %v2412_v59 }
  0xd5   :  { %v426_v59 = vmul.f32 %v2553_v57, %v2553_v57 }
  0xd6   :  { %v2530_v38 = vpop.xlane.xlu2 %194  ;;  %v2532_v4 = vpop.xlane.xlu1 %191  ;;  %v2575_v1 = vsub.f32 %v2032_v49, %v303_v51  ;;  %v305_v49 = vmul.f32 %v2304_v34, %v2450_v6 }
  0xd7   :  { %v2540_v24 = vpop.xlane.xlu0 %188  ;;  %v530_v22 = vsel %vm78_vm0, %v426_v59, 0.0 }
  0xd8   :  { %v431_v43 = vmul.f32 %v2575_v1, %v2575_v1 }
  0xda   :  { %v545_v59 = vsel %vm78_vm0, %v431_v43, 0.0  ;;  %v307_v43 = vmul.f32 %v2304_v34, %v2440_v20 }
  0xdb   :  { %528 = vadd.xlane.f32.xlu2 %v527_v45  ;;  %525 = vadd.xlane.f32.xlu1 %v524_v29  ;;  %v533_v45 = vsel %vm78_vm0, %v427_v36, 0.0  ;;  %v2583_v29 = vsub.f32 %v2006_v42, %v301_v31  ;;  %v430_v42 = vmul.f32 %v2578_v25, %v2578_v25  ;;  %v2608_v31 = vsub.f32 %v2058_v56, %v305_v49 }
  0xdc   :  { %522 = vadd.xlane.f32.xlu0 %v521_v21  ;;  %v306_v21 = vmul.f32 %v2304_v34, %v2442_v5 }
  0xdd   :  { %4564 = vst [vmem:[#allocation32_spill] sm:$0xff] %v2583_v29  ;;  %v429_v5 = vmul.f32 %v2583_v29, %v2583_v29 }
  0xde   :  { %v2560_v44 = vpop.xlane.xlu2 %203  ;;  %v2562_v53 = vpop.xlane.xlu1 %200  ;;  %v2605_v6 = vsub.f32 %v2053_v55, %v306_v21  ;;  %4566 = vst [vmem:[#allocation34_spill] sm:$0xff] %v2608_v31  ;;  %v308_v55 = vmul.f32 %v2304_v34, %v2480_v12 }
  0xdf   :  { %v2570_v30 = vpop.xlane.xlu0 %197  ;;  %v539_v14 = vsel %vm78_vm0, %v429_v5, 0.0 }
  0xe0   :  { %4565 = vst [vmem:[#allocation33_spill] sm:$0xff] %v2605_v6  ;;  %v434_v49 = vmul.f32 %v2605_v6, %v2605_v6 }
  0xe2   :  { %v554_v5 = vsel %vm78_vm0, %v434_v49, 0.0  ;;  %v310_v49 = vmul.f32 %v2304_v34, %v2470_v26 }
  0xe3   :  { %537 = vadd.xlane.f32.xlu2 %v536_v7  ;;  %534 = vadd.xlane.f32.xlu1 %v533_v45  ;;  %v542_v7 = vsel %vm78_vm0, %v430_v42, 0.0  ;;  %v2613_v45 = vsub.f32 %v2027_v48, %v304_v37  ;;  %v433_v48 = vmul.f32 %v2608_v31, %v2608_v31  ;;  %v2638_v37 = vsub.f32 %v2079_v62, %v308_v55 }
  0xe4   :  { %531 = vadd.xlane.f32.xlu0 %v530_v22  ;;  %v309_v22 = vmul.f32 %v2304_v34, %v2472_v27 }
  0xe5   :  { %4567 = vst [vmem:[#allocation35_spill] sm:$0xff] %v2613_v45  ;;  %v432_v27 = vmul.f32 %v2613_v45, %v2613_v45 }
  0xe6   :  { %v2590_v50 = vpop.xlane.xlu2 %212  ;;  %v2592_v51 = vpop.xlane.xlu1 %209  ;;  %v2635_v12 = vsub.f32 %v2074_v61, %v309_v22  ;;  %4569 = vst [vmem:[#allocation37_spill] sm:$0xff] %v2638_v37  ;;  %v311_v61 = vmul.f32 %v2304_v34, %v2510_v18 }
  0xe7   :  { %v2600_v36 = vpop.xlane.xlu0 %206  ;;  %v548_v20 = vsel %vm78_vm0, %v432_v27, 0.0 }
  0xe8   :  { %4568 = vst [vmem:[#allocation36_spill] sm:$0xff] %v2635_v12  ;;  %v437_v55 = vmul.f32 %v2635_v12, %v2635_v12 }
  0xea   :  { %v563_v27 = vsel %vm78_vm0, %v437_v55, 0.0  ;;  %v313_v55 = vmul.f32 %v2304_v34, %v2500_v32 }
  0xeb   :  { %546 = vadd.xlane.f32.xlu2 %v545_v59  ;;  %543 = vadd.xlane.f32.xlu1 %v542_v7  ;;  %v551_v59 = vsel %vm78_vm0, %v433_v48, 0.0  ;;  %v2643_v7 = vsub.f32 %v2048_v54, %v307_v43  ;;  %v436_v54 = vmul.f32 %v2638_v37, %v2638_v37  ;;  %v2668_v43 = vsub.f32 %v2100_v10, %v311_v61 }
  0xec   :  { %540 = vadd.xlane.f32.xlu0 %v539_v14  ;;  %v312_v14 = vmul.f32 %v2304_v34, %v2502_v15 }
  0xed   :  { %4570 = vst [vmem:[#allocation38_spill] sm:$0xff] %v2643_v7  ;;  %v435_v15 = vmul.f32 %v2643_v7, %v2643_v7 }
  0xee   :  { %v2620_v56 = vpop.xlane.xlu2 %221  ;;  %v2622_v21 = vpop.xlane.xlu1 %218  ;;  %v2665_v18 = vsub.f32 %v2095_v9, %v312_v14  ;;  %4572 = vst [vmem:[#allocation40_spill] sm:$0xff] %v2668_v43  ;;  %v314_v9 = vmul.f32 %v2304_v34, %v2540_v24 }
  0xef   :  { %v2630_v42 = vpop.xlane.xlu0 %215  ;;  %v557_v26 = vsel %vm78_vm0, %v435_v15, 0.0  ;;  %v4576_v15 = vld [vmem:[#allocation5_spill] sm:$0xff] }
  0xf0   :  { %4571 = vst [vmem:[#allocation39_spill] sm:$0xff] %v2665_v18  ;;  %v440_v61 = vmul.f32 %v2665_v18, %v2665_v18  ;;  %v4578_v18 = vld [vmem:[#allocation2_spill] sm:$0xff] }
  0xf3   :  { %555 = vadd.xlane.f32.xlu2 %v554_v5  ;;  %552 = vadd.xlane.f32.xlu1 %v551_v59  ;;  %v560_v5 = vsel %vm78_vm0, %v436_v54, 0.0  ;;  %v2673_v59 = vsub.f32 %v2069_v60, %v310_v49  ;;  %v439_v60 = vmul.f32 %v2668_v43, %v2668_v43  ;;  %v4574_v49 = vld [vmem:[#allocation4_spill] sm:$0xff]  ;;  %v2703_v43 = vsub.f32 %v4578_v18, %v313_v55 }
  0xf4   :  { %549 = vadd.xlane.f32.xlu0 %v548_v20  ;;  %v315_v20 = vmul.f32 %v2304_v34, %v2532_v4 }
  0xf5   :  { %4573 = vst [vmem:[#allocation41_spill] sm:$0xff] %v2673_v59  ;;  %v438_v4 = vmul.f32 %v2673_v59, %v2673_v59  ;;  %v318_v59 = vmul.f32 %v2304_v34, %v2562_v53  ;;  %v441_v53 = vmul.f32 %v2703_v43, %v2703_v43 }
  0xf6   :  { %v2650_v62 = vpop.xlane.xlu2 %230  ;;  %v2652_v22 = vpop.xlane.xlu1 %227  ;;  %v2695_v24 = vsub.f32 %v4574_v49, %v315_v20  ;;  %4579 = vst [vmem:[#allocation2_spill] sm:$0xff] %v2703_v43  ;;  %v317_v20 = vmul.f32 %v2304_v34, %v2570_v30  ;;  %v321_v43 = vmul.f32 %v2304_v34, %v2592_v51 }
  0xf7   :  { %v2660_v48 = vpop.xlane.xlu0 %224  ;;  %v566_v32 = vsel %vm78_vm0, %v438_v4, 0.0  ;;  %v4580_v4 = vld [vmem:[#allocation7_spill] sm:$0xff] }
  0xf8   :  { %4575 = vst [vmem:[#allocation4_spill] sm:$0xff] %v2695_v24  ;;  %v2725_v30 = vsub.f32 %v4580_v4, %v318_v59  ;;  %v320_v59 = vmul.f32 %v2304_v34, %v2600_v36  ;;  %v322_v36 = vmul.f32 %v2304_v34, %v2590_v50 }
  0xfa   :  { %4581 = vst [vmem:[#allocation7_spill] sm:$0xff] %v2725_v30 }
  0xfb   :  { %564 = vadd.xlane.f32.xlu2 %v563_v27  ;;  %561 = vadd.xlane.f32.xlu1 %v560_v5  ;;  %v2698_v27 = vsub.f32 %v4576_v15, %v314_v9  ;;  %v572_v5 = vsel %vm78_vm0, %v440_v61, 0.0  ;;  %v443_v61 = vmul.f32 %v2695_v24, %v2695_v24  ;;  %v4582_v15 = vld [vmem:[#allocation8_spill] sm:$0xff]  ;;  %v4584_v24 = vld [vmem:[#allocation3_spill] sm:$0xff] }
  0xfc   :  { %558 = vadd.xlane.f32.xlu0 %v557_v26  ;;  %v569_v26 = vsel %vm78_vm0, %v439_v60, 0.0  ;;  %v316_v60 = vmul.f32 %v2304_v34, %v2530_v38  ;;  %v575_v38 = vsel %vm78_vm0, %v441_v53, 0.0  ;;  %v4586_v53 = vld [vmem:[#allocation10_spill] sm:$0xff] }
  0xfd   :  { %4577 = vst [vmem:[#allocation5_spill] sm:$0xff] %v2698_v27  ;;  %v442_v18 = vmul.f32 %v2698_v27, %v2698_v27 }
  0xfe   :  { %v2680_v10 = vpop.xlane.xlu2 %239  ;;  %v2682_v14 = vpop.xlane.xlu1 %236  ;;  %v2733_v27 = vsub.f32 %v4584_v24, %v316_v60 }
  0xff   :  { %v2690_v54 = vpop.xlane.xlu0 %233 }
 0x100   :  { %4585 = vst [vmem:[#allocation3_spill] sm:$0xff] %v2733_v27  ;;  %v444_v51 = vmul.f32 %v2733_v27, %v2733_v27  ;;  %v327_v27 = vmul.f32 %v2304_v34, %v2652_v22 }
 0x103   :  { %573 = vadd.xlane.f32.xlu2 %v572_v5  ;;  %570 = vadd.xlane.f32.xlu1 %v569_v26  ;;  %v2728_v5 = vsub.f32 %v4582_v15, %v317_v20  ;;  %v581_v26 = vsel %vm78_vm0, %v443_v61, 0.0  ;;  %v446_v61 = vmul.f32 %v2725_v30, %v2725_v30  ;;  %v2757_v15 = vsub.f32 %v4586_v53, %v321_v43  ;;  %v4590_v53 = vld [vmem:[#allocation6_spill] sm:$0xff] }
 0x104   :  { %567 = vadd.xlane.f32.xlu0 %v566_v32  ;;  %v578_v32 = vsel %vm78_vm0, %v442_v18, 0.0  ;;  %v319_v18 = vmul.f32 %v2304_v34, %v2560_v44  ;;  %v323_v44 = vmul.f32 %v2304_v34, %v2630_v42  ;;  %v4594_v42 = vld [vmem:[#allocation13_spill] sm:$0xff] }
 0x105   :  { %4583 = vst [vmem:[#allocation8_spill] sm:$0xff] %v2728_v5  ;;  %v445_v24 = vmul.f32 %v2728_v5, %v2728_v5  ;;  %v590_v50 = vsel %vm78_vm0, %v446_v61, 0.0  ;;  %v449_v22 = vmul.f32 %v2757_v15, %v2757_v15  ;;  %v4596_v61 = vld [vmem:[#allocation12_spill] sm:$0xff] }
 0x106   :  { %v2710_v9 = vpop.xlane.xlu2 %248  ;;  %v2712_v49 = vpop.xlane.xlu1 %245  ;;  %4587 = vst [vmem:[#allocation10_spill] sm:$0xff] %v2757_v15  ;;  %v2773_v30 = vsub.f32 %v4590_v53, %v319_v18 }
 0x107   :  { %v2720_v55 = vpop.xlane.xlu0 %242  ;;  %v587_v43 = vsel %vm78_vm0, %v445_v24, 0.0  ;;  %v4598_v24 = vld [vmem:[#allocation14_spill] sm:$0xff] }
 0x108   :  { %4591 = vst [vmem:[#allocation6_spill] sm:$0xff] %v2773_v30  ;;  %v2788_v18 = vsub.f32 %v4598_v24, %v323_v44  ;;  %v330_v44 = vmul.f32 %v2304_v34, %v2682_v14  ;;  %v331_v24 = vmul.f32 %v2304_v34, %v2680_v10  ;;  %v333_v10 = vmul.f32 %v2304_v34, %v2712_v49 }
 0x10a   :  { %4599 = vst [vmem:[#allocation14_spill] sm:$0xff] %v2788_v18 }
 0x10b   :  { %582 = vadd.xlane.f32.xlu2 %v581_v26  ;;  %579 = vadd.xlane.f32.xlu1 %v578_v32  ;;  %v324_v26 = vmul.f32 %v2304_v34, %v2622_v21  ;;  %v325_v32 = vmul.f32 %v2304_v34, %v2620_v56  ;;  %v584_v21 = vsel %vm78_vm0, %v444_v51, 0.0  ;;  %v4592_v56 = vld [vmem:[#allocation9_spill] sm:$0xff]  ;;  %v328_v51 = vmul.f32 %v2304_v34, %v2650_v62 }
 0x10c   :  { %576 = vadd.xlane.f32.xlu0 %v575_v38  ;;  %v4588_v38 = vld [vmem:[#allocation11_spill] sm:$0xff]  ;;  %v2777_v7 = vsub.f32 %v4592_v56, %v322_v36  ;;  %v326_v36 = vmul.f32 %v2304_v34, %v2660_v48  ;;  %v599_v62 = vsel %vm78_vm0, %v449_v22, 0.0 }
 0x10d   :  { %v2766_v5 = vsub.f32 %v4588_v38, %v320_v59  ;;  %v2780_v59 = vsub.f32 %v4594_v42, %v324_v26  ;;  %v2785_v38 = vsub.f32 %v4596_v61, %v325_v32  ;;  %v447_v32 = vmul.f32 %v2773_v30, %v2773_v30  ;;  %v4602_v42 = vld [vmem:[#allocation15_spill] sm:$0xff]  ;;  %v4604_v30 = vld [vmem:[#allocation17_spill] sm:$0xff] }
 0x10e   :  { %v2740_v20 = vpop.xlane.xlu2 %257  ;;  %v2742_v4 = vpop.xlane.xlu1 %254  ;;  %4593 = vst [vmem:[#allocation9_spill] sm:$0xff] %v2777_v7  ;;  %v2809_v61 = vsub.f32 %v4602_v42, %v328_v51  ;;  %v2818_v22 = vsub.f32 %v4604_v30, %v326_v36  ;;  %v4608_v36 = vld [vmem:[#allocation18_spill] sm:$0xff] }
 0x10f   :  { %v2750_v60 = vpop.xlane.xlu0 %251  ;;  %4589 = vst [vmem:[#allocation11_spill] sm:$0xff] %v2766_v5  ;;  %v452_v48 = vmul.f32 %v2780_v59, %v2780_v59  ;;  %v453_v14 = vmul.f32 %v2785_v38, %v2785_v38  ;;  %v593_v42 = vsel %vm78_vm0, %v447_v32, 0.0 }
 0x110   :  { %4595 = vst [vmem:[#allocation13_spill] sm:$0xff] %v2780_v59  ;;  %v456_v49 = vmul.f32 %v2809_v61, %v2809_v61 }
 0x111   :  { %4597 = vst [vmem:[#allocation12_spill] sm:$0xff] %v2785_v38 }
 0x112   :  { %4603 = vst [vmem:[#allocation15_spill] sm:$0xff] %v2809_v61  ;;  %v4614_v61 = vld [vmem:[#allocation21_spill] sm:$0xff] }
 0x113   :  { %591 = vadd.xlane.f32.xlu2 %v590_v50  ;;  %588 = vadd.xlane.f32.xlu1 %v587_v43  ;;  %v4600_v50 = vld [vmem:[#allocation16_spill] sm:$0xff]  ;;  %4605 = vst [vmem:[#allocation17_spill] sm:$0xff] %v2818_v22 }
 0x114   :  { %585 = vadd.xlane.f32.xlu0 %v584_v21  ;;  %v2793_v43 = vsub.f32 %v4600_v50, %v327_v27  ;;  %v448_v21 = vmul.f32 %v2766_v5, %v2766_v5  ;;  %v450_v27 = vmul.f32 %v2777_v7, %v2777_v7  ;;  %v451_v50 = vmul.f32 %v2788_v18, %v2788_v18  ;;  %v4606_v18 = vld [vmem:[#allocation19_spill] sm:$0xff] }
 0x115   :  { %v329_v7 = vmul.f32 %v2304_v34, %v2690_v54  ;;  %v2829_v38 = vsub.f32 %v4606_v18, %v330_v44  ;;  %v608_v54 = vsel %vm78_vm0, %v452_v48, 0.0  ;;  %v2838_v5 = vsel %vm78_vm0, %v453_v14, 0.0 }
 0x116   :  { %4601 = vst [vmem:[#allocation16_spill] sm:$0xff] %v2793_v43  ;;  %v267_v26 = vpop.xlane.xlu2 %266  ;;  %v264_v53 = vpop.xlane.xlu1 %263  ;;  %v596_v59 = vsel %vm78_vm0, %v448_v21, 0.0  ;;  %v455_v51 = vmul.f32 %v2793_v43, %v2793_v43  ;;  %v602_v30 = vsel %vm78_vm0, %v450_v27, 0.0  ;;  %v2834_v21 = vsub.f32 %v4608_v36, %v331_v24  ;;  %v4612_v24 = vld [vmem:[#allocation22_spill] sm:$0xff] }
 0x117   :  { %v261_v56 = vpop.xlane.xlu0 %260  ;;  %4607 = vst [vmem:[#allocation19_spill] sm:$0xff] %v2829_v38  ;;  %v605_v43 = vsel %vm78_vm0, %v451_v50, 0.0  ;;  %v334_v18 = vmul.f32 %v2304_v34, %v2710_v9  ;;  %v454_v48 = vmul.f32 %v2818_v22, %v2818_v22  ;;  %v2851_v50 = vsub.f32 %v4612_v24, %v333_v10 }
 0x118   :  { %4609 = vst [vmem:[#allocation18_spill] sm:$0xff] %v2834_v21  ;;  %v617_v27 = vsel %vm78_vm0, %v455_v51, 0.0  ;;  %v332_v14 = vmul.f32 %v2304_v34, %v2720_v55  ;;  %v337_v9 = vmul.f32 %v2304_v34, %v2740_v20  ;;  %v336_v51 = vmul.f32 %v2304_v34, %v2742_v4 }
 0x119   :  { %4613 = vst [vmem:[#allocation22_spill] sm:$0xff] %v2851_v50  ;;  %v458_v10 = vmul.f32 %v2829_v38, %v2829_v38  ;;  %v339_v24 = vmul.f32 %v2304_v34, %v264_v53  ;;  %v2873_v20 = vsub.f32 %v4614_v61, %v334_v18  ;;  %v340_v4 = vmul.f32 %v2304_v34, %v267_v26  ;;  %v4616_v38 = vld [vmem:[#allocation23_spill] sm:$0xff]  ;;  %v4618_v18 = vld [vmem:[#allocation24_spill] sm:$0xff] }
 0x11a   :  { %v338_v22 = vmul.f32 %v2304_v34, %v261_v56  ;;  %v2880_v15 = vsub.f32 %v4616_v38, %v332_v14  ;;  %v2884_v53 = vsel %vm78_vm0, %v456_v49, 0.0  ;;  %v461_v61 = vmul.f32 %v2851_v50, %v2851_v50  ;;  %v4620_v56 = vld [vmem:[#allocation25_spill] sm:$0xff]  ;;  %v4624_v38 = vld [vmem:[#allocation28_spill] sm:$0xff] }
 0x11b   :  { %600 = vadd.xlane.f32.xlu2 %v599_v62  ;;  %597 = vadd.xlane.f32.xlu1 %v596_v59  ;;  %v4610_v59 = vld [vmem:[#allocation20_spill] sm:$0xff]  ;;  %4615 = vst [vmem:[#allocation21_spill] sm:$0xff] %v2873_v20  ;;  %v2889_v26 = vsub.f32 %v4618_v18, %v337_v9  ;;  %v2903_v49 = vsel %vm78_vm0, %v458_v10, 0.0  ;;  %v4626_v9 = vld [vmem:[#allocation27_spill] sm:$0xff] }
 0x11c   :  { %594 = vadd.xlane.f32.xlu0 %v593_v42  ;;  %v2843_v32 = vsub.f32 %v4610_v59, %v329_v7  ;;  %v335_v59 = vmul.f32 %v2304_v34, %v2750_v60  ;;  %4617 = vst [vmem:[#allocation23_spill] sm:$0xff] %v2880_v15 }
 0x11d   :  { %4619 = vst [vmem:[#allocation24_spill] sm:$0xff] %v2889_v26 }
 0x11e   :  { %4611 = vst [vmem:[#allocation20_spill] sm:$0xff] %v2843_v32  ;;  %v472_v44 = vpop.xlane.xlu1 %471  ;;  %v475_v62 = vpop.xlane.xlu2 %474  ;;  %v457_v60 = vmul.f32 %v2843_v32, %v2843_v32 }
 0x11f   :  { %v662_v42 = vmul.f32 %v472_v44, %v2304_v34  ;;  %v663_v7 = vmul.f32 %v475_v62, %v2304_v34  ;;  %v270_v36 = vpop.xlane.xlu0 %269  ;;  %v459_v62 = vmul.f32 %v2834_v21, %v2834_v21 }
 0x121   :  { %v2866_v55 = vadd.f32 1e-05, %v662_v42  ;;  %v2868_v44 = vadd.f32 1e-05, %v663_v7  ;;  %v2892_v42 = vsub.f32 %v4620_v56, %v336_v51  ;;  %v4622_v7 = vld [vmem:[#allocation26_spill] sm:$0xff]  ;;  %v2906_v14 = vsel %vm78_vm0, %v459_v62, 0.0 }
 0x122   :  { %v2895_v21 = vsub.f32 %v4622_v7, %v335_v59  ;;  %v2909_v51 = vsub.f32 %v4626_v9, %v340_v4  ;;  %v2912_v59 = vsub.f32 %v2326_v17, %v338_v22  ;;  %v2922_v7 = vsel %vm78_vm0, %v461_v61, 0.0 }
 0x123   :  { %1703 = vrsqrt.f32 %v2866_v55  ;;  %609 = vadd.xlane.f32.xlu2 %v608_v54  ;;  %606 = vadd.xlane.f32.xlu1 %v605_v43  ;;  %4621 = vst [vmem:[#allocation25_spill] sm:$0xff] %v2892_v42  ;;  %v2899_v43 = vsub.f32 %v4624_v38, %v339_v24  ;;  %v614_v54 = vsel %vm78_vm0, %v454_v48, 0.0  ;;  %v462_v48 = vmul.f32 %v2873_v20, %v2873_v20 }
 0x124   :  { %4623 = vst [vmem:[#allocation26_spill] sm:$0xff] %v2895_v21  ;;  %1705 = vrsqrt.f32 %v2868_v44  ;;  %603 = vadd.xlane.f32.xlu0 %v602_v30  ;;  %v2915_v30 = vsel %vm78_vm0, %v457_v60, 0.0  ;;  %v460_v17 = vmul.f32 %v2880_v15, %v2880_v15  ;;  %v464_v4 = vmul.f32 %v2892_v42, %v2892_v42 }
 0x125   :  { %4625 = vst [vmem:[#allocation28_spill] sm:$0xff] %v2899_v43  ;;  %v463_v60 = vmul.f32 %v2895_v21, %v2895_v21  ;;  %v465_v38 = vmul.f32 %v2889_v26, %v2889_v26  ;;  %v466_v26 = vmul.f32 %v2912_v59, %v2912_v59  ;;  %vm796_vm2 = vweird.f32 %v2866_v55 }
 0x126   :  { %4627 = vst [vmem:[#allocation27_spill] sm:$0xff] %v2909_v51  ;;  %v481_v18 = vpop.xlane.xlu1 %480  ;;  %v484_v56 = vpop.xlane.xlu2 %483  ;;  %vm806_vm4 = vweird.f32 %v2868_v44 }
 0x127   :  { %4628 = vst [vmem:[#allocation42_spill] sm:$0xff] %v2912_v59  ;;  %v665_v10 = vmul.f32 %v481_v18, %v2304_v34  ;;  %v666_v24 = vmul.f32 %v484_v56, %v2304_v34  ;;  %v478_v62 = vpop.xlane.xlu0 %477  ;;  %v341_v18 = vmul.f32 %v2304_v34, %v270_v36  ;;  %v468_v36 = vmul.f32 %v2909_v51, %v2909_v51 }
 0x128   :  { %v664_v22 = vmul.f32 %v478_v62, %v2304_v34  ;;  %v467_v62 = vmul.f32 %v2899_v43, %v2899_v43  ;;  %v2959_v43 = vsel %vm78_vm0, %v462_v48, 0.0  ;;  %v2965_v51 = vsel %vm78_vm0, %v464_v4, 0.0 }
 0x129   :  { %v2933_v9 = vpop.eup %1703  ;;  %v2936_v61 = vadd.f32 1e-05, %v665_v10  ;;  %v2938_v56 = vadd.f32 1e-05, %v666_v24  ;;  %v2956_v24 = vsel %vm78_vm0, %v460_v17, 0.0  ;;  %v2968_v59 = vsel %vm78_vm0, %v465_v38, 0.0 }
 0x12a   :  { %v2942_v20 = vpop.eup %1705  ;;  %v791_v42 = vmul.f32 %v2933_v9, %v2866_v55  ;;  %v2946_v21 = vadd.f32 1e-05, %v664_v22  ;;  %v2976_v48 = vsel %vm78_vm0, %v463_v60, 0.0  ;;  %v2982_v4 = vsel %vm78_vm0, %v466_v26, 0.0 }
 0x12b   :  { %v801_v10 = vmul.f32 %v2942_v20, %v2868_v44  ;;  %1707 = vrsqrt.f32 %v2936_v61  ;;  %618 = vadd.xlane.f32.xlu2 %v617_v27  ;;  %615 = vadd.xlane.f32.xlu1 %v614_v54  ;;  %v2972_v54 = vsub.f32 %v2353_v2, %v341_v18  ;;  %v2985_v38 = vsel %vm78_vm0, %v468_v36, 0.0 }
 0x12c   :  { %v792_v22 = vmul.f32 %v2933_v9, %v791_v42  ;;  %1709 = vrsqrt.f32 %v2938_v56  ;;  %612 = vadd.xlane.f32.xlu0 %v2838_v5  ;;  %v2979_v5 = vsel %vm78_vm0, %v467_v62, 0.0  ;;  %vm797_vm3 = vweird.f32 %v2933_v9 }
 0x12d   :  { %v802_v27 = vmul.f32 %v2942_v20, %v801_v10  ;;  %4629 = vst [vmem:[#allocation43_spill] sm:$0xff] %v2972_v54  ;;  %1711 = vrsqrt.f32 %v2946_v21  ;;  %vm807_vm5 = vweird.f32 %v2942_v20  ;;  %vm826_vm6 = vweird.f32 %v2936_v61  ;;  %vm798_vm7 = vmor %vm796_vm2, %vm797_vm3 }
 0x12e   :  { %v793_v42 = vmul.f32 0.5, %v792_v22  ;;  %v493_v17 = vpop.xlane.xlu2 %492  ;;  %v490_v15 = vpop.xlane.xlu1 %489  ;;  %vm808_vm8 = vmor %vm806_vm4, %vm807_vm5  ;;  %vm836_vm9 = vweird.f32 %v2938_v56  ;;  %vm816_vm14 = vweird.f32 %v2946_v21 }
 0x12f   :  { %v803_v2 = vmul.f32 0.5, %v802_v27  ;;  %v669_v18 = vmul.f32 %v493_v17, %v2304_v34  ;;  %v668_v60 = vmul.f32 %v490_v15, %v2304_v34  ;;  %v487_v10 = vpop.xlane.xlu0 %486  ;;  %v3000_v27 = vmul.f32 %v2972_v54, %v2972_v54 }
 0x130   :  { %v794_v22 = vsub.f32 1.5, %v793_v42  ;;  %v667_v62 = vmul.f32 %v487_v10, %v2304_v34 }
 0x131   :  { %v2993_v26 = vpop.eup %1707  ;;  %v804_v50 = vsub.f32 1.5, %v803_v2  ;;  %v2996_v36 = vadd.f32 1e-05, %v669_v18  ;;  %v3008_v10 = vadd.f32 1e-05, %v668_v60 }
 0x132   :  { %v3002_v15 = vpop.eup %1709  ;;  %v795_v42 = vmul.f32 %v2933_v9, %v794_v22  ;;  %v821_v17 = vmul.f32 %v2993_v26, %v2936_v61  ;;  %v3015_v18 = vld [vmem:[%s4462_s1] ss:$0 sm:$0xff]  ;;  %v3025_v60 = vadd.f32 1e-05, %v667_v62  ;;  %vm827_vm10 = vweird.f32 %v2993_v26 }
 0x133   :  { %v3010_v2 = vpop.eup %1711  ;;  %v805_v22 = vmul.f32 %v2942_v20, %v804_v50  ;;  %v831_v54 = vmul.f32 %v3002_v15, %v2938_v56  ;;  %1713 = vrsqrt.f32 %v2996_v36  ;;  %627 = vadd.xlane.f32.xlu2 %v2903_v49  ;;  %624 = vadd.xlane.f32.xlu1 %v2915_v30  ;;  %v3042_v49 = vld [vmem:[%s4463_s2] ss:$0 sm:$0xff]  ;;  %v4630_v30 = vld [vmem:[#allocation29_spill] sm:$0xff]  ;;  %vm837_vm11 = vweird.f32 %v3002_v15  ;;  %vm828_vm13 = vmor %vm826_vm6, %vm827_vm10 }
 0x134   :  { %v799_v32 = vsel %vm798_vm7, %v2933_v9, %v795_v42  ;;  %v822_v50 = vmul.f32 %v2993_v26, %v821_v17  ;;  %v811_v55 = vmul.f32 %v3010_v2, %v2946_v21  ;;  %621 = vadd.xlane.f32.xlu0 %v2884_v53  ;;  %v4631_v42 = vld [vmem:[#allocation30_spill] sm:$0xff]  ;;  %1715 = vrsqrt.f32 %v3008_v10  ;;  %vm838_vm2 = vmor %vm836_vm9, %vm837_vm11 }
 0x135   :  { %v1430_v9 = vmul.f32 %v799_v32, %v4630_v30  ;;  %v809_v62 = vsel %vm808_vm8, %v2942_v20, %v805_v22  ;;  %v832_v44 = vmul.f32 %v3002_v15, %v831_v54  ;;  %1717 = vrsqrt.f32 %v3025_v60 }
 0x136   :  { %v1431_v17 = vmul.f32 %v809_v62, %v4631_v42  ;;  %v823_v37 = vmul.f32 0.5, %v822_v50  ;;  %v812_v12 = vmul.f32 %v3010_v2, %v811_v55  ;;  %v502_v53 = vpop.xlane.xlu2 %501  ;;  %v499_v45 = vpop.xlane.xlu1 %498  ;;  %vm817_vm12 = vweird.f32 %v3010_v2 }
 0x137   :  { %v1498_v31 = vmul.f32 %v3015_v18, %v1430_v9  ;;  %v833_v6 = vmul.f32 0.5, %v832_v44  ;;  %v672_v30 = vmul.f32 %v502_v53, %v2304_v34  ;;  %v671_v9 = vmul.f32 %v499_v45, %v2304_v34  ;;  %v496_v62 = vpop.xlane.xlu0 %495  ;;  %vm818_vm3 = vmor %vm816_vm14, %vm817_vm12 }
 0x138   :  { %v1499_v32 = vmul.f32 %v3015_v18, %v1431_v17  ;;  %v824_v20 = vsub.f32 1.5, %v823_v37  ;;  %v813_v54 = vmul.f32 0.5, %v812_v12  ;;  %vm866_vm15 = vweird.f32 %v2996_v36 }
 0x139   :  { %v3056_v22 = vpop.eup %1713  ;;  %v1566_v50 = vadd.f32 %v3042_v49, %v1498_v31  ;;  %v834_v55 = vsub.f32 1.5, %v833_v6  ;;  %v3092_v61 = vadd.f32 1e-05, %v672_v30  ;;  %vm856_vm7 = vweird.f32 %v3008_v10 }
 0x13a   :  { %v1567_v44 = vadd.f32 %v3042_v49, %v1499_v32  ;;  %v825_v42 = vmul.f32 %v2993_v26, %v824_v20  ;;  %v814_v29 = vsub.f32 1.5, %v813_v54  ;;  %v861_v12 = vmul.f32 %v3056_v22, %v2996_v36  ;;  %v3079_v31 = vpop.eup %1715 }
 0x13b   :  { %1630 = vst.msk [vmem:[%s4464_s3] sm:$0xff] %vm78_vm0, %v1566_v50  ;;  %v835_v6 = vmul.f32 %v3002_v15, %v834_v55  ;;  %vm867_vm1 = vweird.f32 %v3056_v22  ;;  %636 = vadd.xlane.f32.xlu2 %v2922_v7  ;;  %633 = vadd.xlane.f32.xlu1 %v2956_v24  ;;  %v3094_v24 = vpop.eup %1717  ;;  %v851_v56 = vmul.f32 %v3079_v31, %v3008_v10  ;;  %v4632_v50 = vld [vmem:[#allocation31_spill] sm:$0xff]  ;;  %1719 = vrsqrt.f32 %v3092_v61 }
 0x13c   :  { %1631 = vst.msk [vmem:[%s4464_s3 + $0x8] sm:$0xff] %vm78_vm0, %v1567_v44  ;;  %v829_v45 = vsel %vm828_vm13, %v2993_v26, %v825_v42  ;;  %v815_v37 = vmul.f32 %v3010_v2, %v814_v29  ;;  %v862_v7 = vmul.f32 %v3056_v22, %v861_v12  ;;  %v3104_v26 = vadd.f32 1e-05, %v671_v9  ;;  %630 = vadd.xlane.f32.xlu0 %v2906_v14  ;;  %vm868_vm5 = vmor %vm866_vm15, %vm867_vm1 }
 0x13d   :  { %v1433_v17 = vmul.f32 %v829_v45, %v2369_v23  ;;  %v839_v53 = vsel %vm838_vm2, %v3002_v15, %v835_v6  ;;  %v841_v23 = vmul.f32 %v3094_v24, %v3025_v60  ;;  %v852_v30 = vmul.f32 %v3079_v31, %v851_v56 }
 0x13e   :  { %v1434_v29 = vmul.f32 %v839_v53, %v2366_v40  ;;  %v819_v32 = vsel %vm818_vm3, %v3010_v2, %v815_v37  ;;  %v863_v20 = vmul.f32 0.5, %v862_v7  ;;  %v511_v15 = vpop.xlane.xlu2 %510  ;;  %v508_v54 = vpop.xlane.xlu1 %507  ;;  %v670_v9 = vmul.f32 %v496_v62, %v2304_v34 }
 0x13f   :  { %v1501_v21 = vmul.f32 %v3015_v18, %v1433_v17  ;;  %v1432_v55 = vmul.f32 %v819_v32, %v4632_v50  ;;  %v842_v40 = vmul.f32 %v3094_v24, %v841_v23  ;;  %v853_v12 = vmul.f32 0.5, %v852_v30  ;;  %v505_v53 = vpop.xlane.xlu0 %504 }
 0x140   :  { %v1502_v14 = vmul.f32 %v3015_v18, %v1434_v29  ;;  %v864_v44 = vsub.f32 1.5, %v863_v20  ;;  %vm857_vm4 = vweird.f32 %v3079_v31  ;;  %1721 = vrsqrt.f32 %v3104_v26 }
 0x141   :  { %v1569_v2 = vadd.f32 %v3042_v49, %v1501_v21  ;;  %v1500_v42 = vmul.f32 %v3015_v18, %v1432_v55  ;;  %v843_v37 = vmul.f32 0.5, %v842_v40  ;;  %v854_v7 = vsub.f32 1.5, %v853_v12  ;;  %vm858_vm8 = vmor %vm856_vm7, %vm857_vm4 }
 0x142   :  { %v1570_v6 = vadd.f32 %v3042_v49, %v1502_v14  ;;  %v865_v45 = vmul.f32 %v3056_v22, %v864_v44  ;;  %vm847_vm6 = vweird.f32 %v3094_v24  ;;  %v3134_v17 = vadd.f32 1e-05, %v670_v9 }
 0x143   :  { %1633 = vst.msk [vmem:[%s4464_s3 + $0x18] sm:$0xff] %vm78_vm0, %v1569_v2  ;;  %v1568_v62 = vadd.f32 %v3042_v49, %v1500_v42  ;;  %645 = vadd.xlane.f32.xlu2 %v2965_v51  ;;  %642 = vadd.xlane.f32.xlu1 %v2976_v48  ;;  %v844_v29 = vsub.f32 1.5, %v843_v37  ;;  %v675_v36 = vmul.f32 %v511_v15, %v2304_v34  ;;  %vm846_vm9 = vweird.f32 %v3025_v60 }
 0x144   :  { %1634 = vst.msk [vmem:[%s4464_s3 + $0x20] sm:$0xff] %vm78_vm0, %v1570_v6  ;;  %v869_v56 = vsel %vm868_vm5, %v3056_v22, %v865_v45  ;;  %v674_v32 = vmul.f32 %v508_v54, %v2304_v34  ;;  %v855_v48 = vmul.f32 %v3079_v31, %v854_v7  ;;  %1723 = vrsqrt.f32 %v3134_v17  ;;  %639 = vadd.xlane.f32.xlu0 %v2959_v43  ;;  %v3154_v22 = vpop.eup %1719  ;;  %vm848_vm10 = vmor %vm846_vm9, %vm847_vm6 }
 0x145   :  { %1632 = vst.msk [vmem:[%s4464_s3 + $0x10] sm:$0xff] %vm78_vm0, %v1568_v62  ;;  %v1437_v51 = vmul.f32 %v869_v56, %v2395_v47  ;;  %v845_v20 = vmul.f32 %v3094_v24, %v844_v29  ;;  %v3160_v23 = vadd.f32 1e-05, %v675_v36  ;;  %v891_v43 = vmul.f32 %v3154_v22, %v3092_v61 }
 0x146   :  { %v3162_v47 = vadd.f32 1e-05, %v674_v32  ;;  %v520_v15 = vpop.xlane.xlu2 %519  ;;  %v859_v54 = vsel %vm858_vm8, %v3079_v31, %v855_v48  ;;  %v673_v21 = vmul.f32 %v505_v53, %v2304_v34  ;;  %v517_v50 = vpop.xlane.xlu1 %516  ;;  %v659_v31 = vsel %vm78_vm0, %v3000_v27, 0.0 }
 0x147   :  { %v1505_v10 = vmul.f32 %v3015_v18, %v1437_v51  ;;  %v3171_v55 = vpop.eup %1721  ;;  %v1436_v60 = vmul.f32 %v859_v54, %v2398_v33  ;;  %v849_v30 = vsel %vm848_vm10, %v3094_v24, %v845_v20  ;;  %1725 = vrsqrt.f32 %v3160_v23  ;;  %v514_v53 = vpop.xlane.xlu0 %513 }
 0x148   :  { %v1435_v14 = vmul.f32 %v849_v30, %v2403_v3  ;;  %v892_v44 = vmul.f32 %v3154_v22, %v891_v43  ;;  %v881_v40 = vmul.f32 %v3171_v55, %v3104_v26  ;;  %vm896_vm11 = vweird.f32 %v3092_v61 }
 0x149   :  { %v1573_v9 = vadd.f32 %v3042_v49, %v1505_v10  ;;  %v1504_v2 = vmul.f32 %v3015_v18, %v1436_v60  ;;  %vm886_vm12 = vweird.f32 %v3104_v26  ;;  %1727 = vrsqrt.f32 %v3162_v47 }
 0x14a   :  { %v3187_v33 = vpop.eup %1723  ;;  %v1503_v3 = vmul.f32 %v3015_v18, %v1435_v14  ;;  %v893_v27 = vmul.f32 0.5, %v892_v44  ;;  %v882_v24 = vmul.f32 %v3171_v55, %v881_v40  ;;  %v3195_v42 = vadd.f32 1e-05, %v673_v21 }
 0x14b   :  { %1637 = vst.msk [vmem:[%s4464_s3 + $0x38] sm:$0xff] %vm78_vm0, %v1573_v9  ;;  %654 = vadd.xlane.f32.xlu2 %v2979_v5  ;;  %651 = vadd.xlane.f32.xlu1 %v2982_v4  ;;  %v1572_v12 = vadd.f32 %v3042_v49, %v1504_v2  ;;  %vm897_vm13 = vweird.f32 %v3154_v22  ;;  %v871_v6 = vmul.f32 %v3187_v33, %v3134_v17  ;;  %vm876_vm14 = vweird.f32 %v3134_v17 }
 0x14c   :  { %v678_v45 = vmul.f32 %v520_v15, %v2304_v34  ;;  %v1571_v37 = vadd.f32 %v3042_v49, %v1503_v3  ;;  %v894_v62 = vsub.f32 1.5, %v893_v27  ;;  %v883_v7 = vmul.f32 0.5, %v882_v24  ;;  %648 = vadd.xlane.f32.xlu0 %v2968_v59  ;;  %vm898_vm1 = vmor %vm896_vm11, %vm897_vm13 }
 0x14d   :  { %1729 = vrsqrt.f32 %v3195_v42  ;;  %v3207_v5 = vpop.eup %1725  ;;  %1636 = vst.msk [vmem:[%s4464_s3 + $0x30] sm:$0xff] %vm78_vm0, %v1572_v12  ;;  %v872_v4 = vmul.f32 %v3187_v33, %v871_v6  ;;  %v677_v29 = vmul.f32 %v517_v50, %v2304_v34  ;;  %vm887_vm15 = vweird.f32 %v3171_v55 }
 0x14e   :  { %v3215_v56 = vadd.f32 1e-05, %v678_v45  ;;  %1635 = vst.msk [vmem:[%s4464_s3 + $0x28] sm:$0xff] %vm78_vm0, %v1571_v37  ;;  %v895_v59 = vmul.f32 %v3154_v22, %v894_v62  ;;  %v884_v36 = vsub.f32 1.5, %v883_v7  ;;  %v921_v32 = vmul.f32 %v3207_v5, %v3160_v23  ;;  %v3226_v51 = vpop.xlane.xlu2 %528  ;;  %v3244_v61 = vpop.xlane.xlu1 %525  ;;  %vm888_vm4 = vmor %vm886_vm12, %vm887_vm15 }
 0x14f   :  { %v3228_v48 = vpop.eup %1727  ;;  %v873_v20 = vmul.f32 0.5, %v872_v4  ;;  %vm926_vm2 = vweird.f32 %v3160_v23  ;;  %v3236_v15 = vadd.f32 1e-05, %v677_v29  ;;  %vm916_vm3 = vweird.f32 %v3162_v47 }
 0x150   :  { %1731 = vrsqrt.f32 %v3215_v56  ;;  %v899_v10 = vsel %vm898_vm1, %v3154_v22, %v895_v59  ;;  %v885_v54 = vmul.f32 %v3171_v55, %v884_v36  ;;  %v922_v43 = vmul.f32 %v3207_v5, %v921_v32 }
 0x151   :  { %v911_v21 = vmul.f32 %v3228_v48, %v3162_v47  ;;  %v1440_v50 = vmul.f32 %v899_v10, %v2425_v35  ;;  %v874_v60 = vsub.f32 1.5, %v873_v20  ;;  %vm877_vm5 = vweird.f32 %v3187_v33 }
 0x152   :  { %1733 = vrsqrt.f32 %v3236_v15  ;;  %v889_v30 = vsel %vm888_vm4, %v3171_v55, %v885_v54  ;;  %v923_v9 = vmul.f32 0.5, %v922_v43  ;;  %vm927_vm6 = vweird.f32 %v3207_v5  ;;  %vm878_vm8 = vmor %vm876_vm14, %vm877_vm5 }
 0x153   :  { %v3253_v22 = vpop.eup %1729  ;;  %v912_v14 = vmul.f32 %v3228_v48, %v911_v21  ;;  %660 = vadd.xlane.f32.xlu1 %v659_v31  ;;  %v1508_v35 = vmul.f32 %v3015_v18, %v1440_v50  ;;  %v1439_v26 = vmul.f32 %v889_v30, %v2428_v39  ;;  %v875_v44 = vmul.f32 %v3187_v33, %v874_v60  ;;  %vm928_vm11 = vmor %vm926_vm2, %vm927_vm6 }
 0x154   :  { %v901_v40 = vmul.f32 %v3253_v22, %v3195_v42  ;;  %vm906_vm7 = vweird.f32 %v3195_v42  ;;  %v924_v55 = vsub.f32 1.5, %v923_v9  ;;  %vm917_vm9 = vweird.f32 %v3228_v48  ;;  %657 = vadd.xlane.f32.xlu0 %v2985_v38  ;;  %v523_v38 = vpop.xlane.xlu0 %522 }
 0x155   :  { %v913_v2 = vmul.f32 0.5, %v912_v14  ;;  %v676_v31 = vmul.f32 %v514_v53, %v2304_v34  ;;  %v1576_v39 = vadd.f32 %v3042_v49, %v1508_v35  ;;  %v1507_v27 = vmul.f32 %v3015_v18, %v1439_v26  ;;  %vm918_vm13 = vmor %vm916_vm3, %vm917_vm9 }
 0x156   :  { %v3269_v3 = vpop.eup %1731  ;;  %v879_v24 = vsel %vm878_vm8, %v3187_v33, %v875_v44  ;;  %v902_v12 = vmul.f32 %v3253_v22, %v901_v40  ;;  %v925_v6 = vmul.f32 %v3207_v5, %v924_v55  ;;  %vm956_vm10 = vweird.f32 %v3215_v56  ;;  %v538_v36 = vpop.xlane.xlu2 %537 }
 0x157   :  { %v1438_v17 = vmul.f32 %v879_v24, %v2433_v28  ;;  %v914_v45 = vsub.f32 1.5, %v913_v2  ;;  %v951_v37 = vmul.f32 %v3269_v3, %v3215_v56  ;;  %1640 = vst.msk [vmem:[%s4464_s3 + $0x50] sm:$0xff] %vm78_vm0, %v1576_v39  ;;  %v1575_v33 = vadd.f32 %v3042_v49, %v1507_v27  ;;  %v535_v43 = vpop.xlane.xlu1 %534 }
 0x158   :  { %v3280_v62 = vpop.eup %1733  ;;  %v903_v28 = vmul.f32 0.5, %v902_v12  ;;  %vm907_vm12 = vweird.f32 %v3253_v22  ;;  %v3292_v7 = vadd.f32 1e-05, %v676_v31  ;;  %v929_v4 = vsel %vm928_vm11, %v3207_v5, %v925_v6 }
 0x159   :  { %v1506_v53 = vmul.f32 %v3015_v18, %v1438_v17  ;;  %v915_v29 = vmul.f32 %v3228_v48, %v914_v45  ;;  %v952_v59 = vmul.f32 %v3269_v3, %v951_v37  ;;  %1639 = vst.msk [vmem:[%s4464_s3 + $0x48] sm:$0xff] %vm78_vm0, %v1575_v33  ;;  %v1443_v23 = vmul.f32 %v929_v4, %v2455_v41  ;;  %vm908_vm15 = vmor %vm906_vm7, %vm907_vm12 }
 0x15a   :  { %v904_v32 = vsub.f32 1.5, %v903_v28  ;;  %vm957_vm14 = vweird.f32 %v3269_v3  ;;  %v941_v5 = vmul.f32 %v3280_v62, %v3236_v15  ;;  %1735 = vrsqrt.f32 %v3292_v7 }
 0x15b   :  { %v1574_v20 = vadd.f32 %v3042_v49, %v1506_v53  ;;  %v919_v10 = vsel %vm918_vm13, %v3228_v48, %v915_v29  ;;  %v953_v54 = vmul.f32 0.5, %v952_v59  ;;  %v1511_v41 = vmul.f32 %v3015_v18, %v1443_v23  ;;  %vm958_vm2 = vmor %vm956_vm10, %vm957_vm14 }
 0x15c   :  { %v1442_v21 = vmul.f32 %v919_v10, %v2458_v46  ;;  %v905_v47 = vmul.f32 %v3253_v22, %v904_v32  ;;  %v942_v50 = vmul.f32 %v3280_v62, %v941_v5  ;;  %vm947_vm1 = vweird.f32 %v3280_v62  ;;  %v532_v39 = vpop.xlane.xlu0 %531 }
 0x15d   :  { %1638 = vst.msk [vmem:[%s4464_s3 + $0x40] sm:$0xff] %vm78_vm0, %v1574_v20  ;;  %v954_v48 = vsub.f32 1.5, %v953_v54  ;;  %v681_v46 = vmul.f32 %v3226_v51, %v2304_v34  ;;  %v680_v60 = vmul.f32 %v3244_v61, %v2304_v34  ;;  %v1579_v30 = vadd.f32 %v3042_v49, %v1511_v41 }
 0x15e   :  { %v1510_v9 = vmul.f32 %v3015_v18, %v1442_v21  ;;  %v909_v14 = vsel %vm908_vm15, %v3253_v22, %v905_v47  ;;  %v943_v35 = vmul.f32 0.5, %v942_v50  ;;  %v684_v22 = vmul.f32 %v538_v36, %v2304_v34  ;;  %v547_v17 = vpop.xlane.xlu2 %546 }
 0x15f   :  { %v1441_v26 = vmul.f32 %v909_v14, %v2463_v58  ;;  %v955_v42 = vmul.f32 %v3269_v3, %v954_v48  ;;  %v3335_v44 = vadd.f32 1e-05, %v681_v46  ;;  %v3337_v40 = vadd.f32 1e-05, %v680_v60  ;;  %1643 = vst.msk [vmem:[%s4464_s3 + $0x68] sm:$0xff] %vm78_vm0, %v1579_v30  ;;  %v544_v33 = vpop.xlane.xlu1 %543 }
 0x160   :  { %v1578_v51 = vadd.f32 %v3042_v49, %v1510_v9  ;;  %v944_v61 = vsub.f32 1.5, %v943_v35  ;;  %v679_v58 = vmul.f32 %v523_v38, %v2304_v34  ;;  %v1736_v55 = vpop.eup %1735  ;;  %vm946_vm3 = vweird.f32 %v3236_v15 }
 0x161   :  { %v1509_v2 = vmul.f32 %v3015_v18, %v1441_v26  ;;  %v959_v31 = vsel %vm958_vm2, %v3269_v3, %v955_v42  ;;  %1737 = vrsqrt.f32 %v3335_v44  ;;  %v931_v24 = vmul.f32 %v1736_v55, %v3292_v7  ;;  %vm948_vm4 = vmor %vm946_vm3, %vm947_vm1 }
 0x162   :  { %1642 = vst.msk [vmem:[%s4464_s3 + $0x60] sm:$0xff] %vm78_vm0, %v1578_v51  ;;  %v1446_v56 = vmul.f32 %v959_v31, %v2485_v52  ;;  %v945_v27 = vmul.f32 %v3280_v62, %v944_v61  ;;  %1739 = vrsqrt.f32 %v3337_v40  ;;  %v3365_v3 = vadd.f32 1e-05, %v679_v58 }
 0x163   :  { %v1577_v12 = vadd.f32 %v3042_v49, %v1509_v2  ;;  %v932_v45 = vmul.f32 %v1736_v55, %v931_v24  ;;  %v3369_v37 = vadd.f32 1e-05, %v684_v22  ;;  %v683_v38 = vmul.f32 %v535_v43, %v2304_v34 }
 0x164   :  { %v1514_v6 = vmul.f32 %v3015_v18, %v1446_v56  ;;  %v949_v52 = vsel %vm948_vm4, %v3280_v62, %v945_v27  ;;  %1741 = vrsqrt.f32 %v3365_v3  ;;  %v682_v59 = vmul.f32 %v532_v39, %v2304_v34  ;;  %v541_v50 = vpop.xlane.xlu0 %540 }
 0x165   :  { %1641 = vst.msk [vmem:[%s4464_s3 + $0x58] sm:$0xff] %vm78_vm0, %v1577_v12  ;;  %v1445_v15 = vmul.f32 %v949_v52, %v2488_v0  ;;  %v933_v53 = vmul.f32 0.5, %v932_v45  ;;  %1743 = vrsqrt.f32 %v3369_v37  ;;  %v3383_v29 = vadd.f32 1e-05, %v683_v38 }
 0x166   :  { %v1582_v28 = vadd.f32 %v3042_v49, %v1514_v6  ;;  %v687_v0 = vmul.f32 %v547_v17, %v2304_v34  ;;  %vm937_vm5 = vweird.f32 %v1736_v55  ;;  %v686_v32 = vmul.f32 %v544_v33, %v2304_v34  ;;  %v3428_v26 = vpop.xlane.xlu2 %555 }
 0x167   :  { %v3380_v62 = vpop.eup %1737  ;;  %v1513_v4 = vmul.f32 %v3015_v18, %v1445_v15  ;;  %v934_v36 = vsub.f32 1.5, %v933_v53  ;;  %vm936_vm6 = vweird.f32 %v3292_v7  ;;  %1745 = vrsqrt.f32 %v3383_v29  ;;  %v3454_v45 = vpop.xlane.xlu1 %552 }
 0x168   :  { %1646 = vst.msk [vmem:[%s4464_s3 + $0x80] sm:$0xff] %vm78_vm0, %v1582_v28  ;;  %v981_v23 = vmul.f32 %v3380_v62, %v3335_v44  ;;  %v3394_v5 = vpop.eup %1739  ;;  %v3399_v10 = vadd.f32 1e-05, %v682_v59  ;;  %vm986_vm7 = vweird.f32 %v3335_v44  ;;  %vm938_vm8 = vmor %vm936_vm6, %vm937_vm5  ;;  %vm976_vm9 = vweird.f32 %v3337_v40 }
 0x169   :  { %v1581_v20 = vadd.f32 %v3042_v49, %v1513_v4  ;;  %v935_v54 = vmul.f32 %v1736_v55, %v934_v36  ;;  %v971_v41 = vmul.f32 %v3394_v5, %v3337_v40  ;;  %v3413_v7 = vadd.f32 1e-05, %v687_v0 }
 0x16a   :  { %v982_v43 = vmul.f32 %v3380_v62, %v981_v23  ;;  %v3405_v21 = vpop.eup %1741  ;;  %1747 = vrsqrt.f32 %v3399_v10  ;;  %v3415_v47 = vadd.f32 1e-05, %v686_v32  ;;  %vm966_vm10 = vweird.f32 %v3365_v3 }
 0x16b   :  { %1645 = vst.msk [vmem:[%s4464_s3 + $0x78] sm:$0xff] %vm78_vm0, %v1581_v20  ;;  %v3417_v48 = vpop.eup %1743  ;;  %v939_v46 = vsel %vm938_vm8, %v1736_v55, %v935_v54  ;;  %v972_v30 = vmul.f32 %v3394_v5, %v971_v41  ;;  %v961_v9 = vmul.f32 %v3405_v21, %v3365_v3  ;;  %vm987_vm11 = vweird.f32 %v3380_v62 }
 0x16c   :  { %v983_v60 = vmul.f32 0.5, %v982_v43  ;;  %v1444_v14 = vmul.f32 %v939_v46, %v2493_v16  ;;  %v1011_v35 = vmul.f32 %v3417_v48, %v3369_v37  ;;  %vm1016_vm12 = vweird.f32 %v3369_v37  ;;  %vm988_vm15 = vmor %vm986_vm7, %vm987_vm11  ;;  %v550_v36 = vpop.xlane.xlu0 %549 }
 0x16d   :  { %v973_v51 = vmul.f32 0.5, %v972_v30  ;;  %v962_v61 = vmul.f32 %v3405_v21, %v961_v9  ;;  %1749 = vrsqrt.f32 %v3413_v7  ;;  %v3432_v58 = vpop.eup %1745  ;;  %vm977_vm13 = vweird.f32 %v3394_v5 }
 0x16e   :  { %v984_v42 = vsub.f32 1.5, %v983_v60  ;;  %v1512_v22 = vmul.f32 %v3015_v18, %v1444_v14  ;;  %v1012_v16 = vmul.f32 %v3417_v48, %v1011_v35  ;;  %1751 = vrsqrt.f32 %v3415_v47  ;;  %vm978_vm3 = vmor %vm976_vm9, %vm977_vm13  ;;  %v565_v41 = vpop.xlane.xlu2 %564 }
 0x16f   :  { %v974_v2 = vsub.f32 1.5, %v973_v51  ;;  %v963_v31 = vmul.f32 0.5, %v962_v61  ;;  %v1001_v39 = vmul.f32 %v3432_v58, %v3383_v29  ;;  %vm1006_vm14 = vweird.f32 %v3383_v29 }
 0x170   :  { %v985_v55 = vmul.f32 %v3380_v62, %v984_v42  ;;  %v3442_v56 = vpop.eup %1747  ;;  %v1580_v27 = vadd.f32 %v3042_v49, %v1512_v22  ;;  %vm967_vm1 = vweird.f32 %v3405_v21  ;;  %v1013_v24 = vmul.f32 0.5, %v1012_v16 }
 0x171   :  { %vm1017_vm2 = vweird.f32 %v3417_v48  ;;  %v975_v17 = vmul.f32 %v3394_v5, %v974_v2  ;;  %v964_v6 = vsub.f32 1.5, %v963_v31  ;;  %v1002_v52 = vmul.f32 %v3432_v58, %v1001_v39  ;;  %vm968_vm7 = vmor %vm966_vm10, %vm967_vm1 }
 0x172   :  { %v989_v12 = vsel %vm988_vm15, %v3380_v62, %v985_v55  ;;  %1644 = vst.msk [vmem:[%s4464_s3 + $0x70] sm:$0xff] %vm78_vm0, %v1580_v27  ;;  %v1014_v15 = vsub.f32 1.5, %v1013_v24  ;;  %vm1007_vm4 = vweird.f32 %v3432_v58  ;;  %v991_v38 = vmul.f32 %v3442_v56, %v3399_v10  ;;  %vm1018_vm8 = vmor %vm1016_vm12, %vm1017_vm2  ;;  %v562_v55 = vpop.xlane.xlu1 %561 }
 0x173   :  { %v1449_v44 = vmul.f32 %v989_v12, %v2515_v63  ;;  %v3468_v33 = vpop.eup %1749  ;;  %v979_v28 = vsel %vm978_vm3, %v3394_v5, %v975_v17  ;;  %v965_v53 = vmul.f32 %v3405_v21, %v964_v6  ;;  %v1003_v62 = vmul.f32 0.5, %v1002_v52  ;;  %vm1008_vm10 = vmor %vm1006_vm14, %vm1007_vm4 }
 0x174   :  { %vm996_vm5 = vweird.f32 %v3399_v10  ;;  %vm997_vm6 = vweird.f32 %v3442_v56  ;;  %v3474_v63 = vpop.eup %1751  ;;  %v1448_v4 = vmul.f32 %v979_v28, %v2518_v13  ;;  %v1015_v59 = vmul.f32 %v3417_v48, %v1014_v15 }
 0x175   :  { %v1517_v40 = vmul.f32 %v3015_v18, %v1449_v44  ;;  %v992_v0 = vmul.f32 %v3442_v56, %v991_v38  ;;  %v969_v23 = vsel %vm968_vm7, %v3405_v21, %v965_v53  ;;  %v1004_v32 = vsub.f32 1.5, %v1003_v62  ;;  %vm998_vm12 = vmor %vm996_vm5, %vm997_vm6 }
 0x176   :  { %v1041_v13 = vmul.f32 %v3468_v33, %v3413_v7  ;;  %vm1046_vm9 = vweird.f32 %v3413_v7  ;;  %v685_v3 = vmul.f32 %v541_v50, %v2304_v34  ;;  %v1516_v20 = vmul.f32 %v3015_v18, %v1448_v4  ;;  %v574_v15 = vpop.xlane.xlu2 %573 }
 0x177   :  { %v1585_v5 = vadd.f32 %v3042_v49, %v1517_v40  ;;  %v1447_v54 = vmul.f32 %v969_v23, %v2523_v11  ;;  %v1019_v43 = vsel %vm1018_vm8, %v3417_v48, %v1015_v59  ;;  %v1005_v21 = vmul.f32 %v3432_v58, %v1004_v32 }
 0x178   :  { %v1452_v37 = vmul.f32 %v1019_v43, %v2545_v8  ;;  %v993_v46 = vmul.f32 0.5, %v992_v0  ;;  %v1042_v60 = vmul.f32 %v3468_v33, %v1041_v13  ;;  %v1584_v50 = vadd.f32 %v3042_v49, %v1516_v20 }
 0x179   :  { %1649 = vst.msk [vmem:[%s4464_s3 + $0x98] sm:$0xff] %vm78_vm0, %v1585_v5  ;;  %v1515_v30 = vmul.f32 %v3015_v18, %v1447_v54  ;;  %vm1047_vm11 = vweird.f32 %v3468_v33  ;;  %v1031_v11 = vmul.f32 %v3474_v63, %v3415_v47  ;;  %v1009_v48 = vsel %vm1008_vm10, %v3432_v58, %v1005_v21 }
 0x17a   :  { %v1520_v8 = vmul.f32 %v3015_v18, %v1452_v37  ;;  %v994_v9 = vsub.f32 1.5, %v993_v46  ;;  %v1043_v14 = vmul.f32 0.5, %v1042_v60  ;;  %1648 = vst.msk [vmem:[%s4464_s3 + $0x90] sm:$0xff] %vm78_vm0, %v1584_v50  ;;  %v1451_v29 = vmul.f32 %v1009_v48, %v2548_v19  ;;  %vm1048_vm14 = vmor %vm1046_vm9, %vm1047_vm11  ;;  %v571_v13 = vpop.xlane.xlu1 %570 }
 0x17b   :  { %v1583_v35 = vadd.f32 %v3042_v49, %v1515_v30  ;;  %v1032_v42 = vmul.f32 %v3474_v63, %v1031_v11  ;;  %v3522_v51 = vadd.f32 1e-05, %v685_v3  ;;  %v690_v16 = vmul.f32 %v3428_v26, %v2304_v34 }
 0x17c   :  { %v1588_v61 = vadd.f32 %v3042_v49, %v1520_v8  ;;  %v995_v22 = vmul.f32 %v3442_v56, %v994_v9  ;;  %v1044_v58 = vsub.f32 1.5, %v1043_v14  ;;  %v1519_v19 = vmul.f32 %v3015_v18, %v1451_v29 }
 0x17d   :  { %1647 = vst.msk [vmem:[%s4464_s3 + $0x88] sm:$0xff] %vm78_vm0, %v1583_v35  ;;  %v1033_v2 = vmul.f32 0.5, %v1032_v42  ;;  %vm1037_vm13 = vweird.f32 %v3474_v63  ;;  %1753 = vrsqrt.f32 %v3522_v51  ;;  %v3545_v39 = vadd.f32 1e-05, %v690_v16 }
 0x17e   :  { %1652 = vst.msk [vmem:[%s4464_s3 + $0xb0] sm:$0xff] %vm78_vm0, %v1588_v61  ;;  %v999_v26 = vsel %vm998_vm12, %v3442_v56, %v995_v22  ;;  %v1045_v31 = vmul.f32 %v3468_v33, %v1044_v58  ;;  %v689_v10 = vmul.f32 %v3454_v45, %v2304_v34  ;;  %v1587_v27 = vadd.f32 %v3042_v49, %v1519_v19  ;;  %v559_v56 = vpop.xlane.xlu0 %558  ;;  %v3629_v9 = vpop.xlane.xlu2 %582 }
 0x17f   :  { %v1450_v24 = vmul.f32 %v999_v26, %v2553_v57  ;;  %v1034_v12 = vsub.f32 1.5, %v1033_v2  ;;  %v688_v17 = vmul.f32 %v550_v36, %v2304_v34  ;;  %vm1036_vm15 = vweird.f32 %v3415_v47 }
 0x180   :  { %v1049_v6 = vsel %vm1048_vm14, %v3468_v33, %v1045_v31  ;;  %1755 = vrsqrt.f32 %v3545_v39  ;;  %v3559_v52 = vadd.f32 1e-05, %v689_v10  ;;  %1651 = vst.msk [vmem:[%s4464_s3 + $0xa8] sm:$0xff] %vm78_vm0, %v1587_v27  ;;  %vm1038_vm1 = vmor %vm1036_vm15, %vm1037_vm13  ;;  %v693_v47 = vmul.f32 %v565_v41, %v2304_v34 }
 0x181   :  { %v1518_v57 = vmul.f32 %v3015_v18, %v1450_v24  ;;  %v1455_v7 = vmul.f32 %v1049_v6, %v2575_v1  ;;  %v1035_v45 = vmul.f32 %v3474_v63, %v1034_v12  ;;  %v3568_v44 = vadd.f32 1e-05, %v688_v17 }
 0x182   :  { %1757 = vrsqrt.f32 %v3559_v52  ;;  %v692_v38 = vmul.f32 %v562_v55, %v2304_v34  ;;  %v3586_v59 = vadd.f32 1e-05, %v693_v47  ;;  %v691_v36 = vmul.f32 %v559_v56, %v2304_v34  ;;  %v3662_v17 = vpop.xlane.xlu1 %579 }
 0x183   :  { %v1754_v33 = vpop.eup %1753  ;;  %v1586_v28 = vadd.f32 %v3042_v49, %v1518_v57  ;;  %v1523_v53 = vmul.f32 %v3015_v18, %v1455_v7  ;;  %v1039_v1 = vsel %vm1038_vm1, %v3474_v63, %v1035_v45  ;;  %1759 = vrsqrt.f32 %v3568_v44 }
 0x184   :  { %v1454_v62 = vmul.f32 %v1039_v1, %v2578_v25  ;;  %v1021_v40 = vmul.f32 %v1754_v33, %v3522_v51  ;;  %v3588_v0 = vadd.f32 1e-05, %v692_v38  ;;  %v696_v32 = vmul.f32 %v574_v15, %v2304_v34  ;;  %v4634_v15 = vld [vmem:[#allocation33_spill] sm:$0xff] }
 0x185   :  { %1650 = vst.msk [vmem:[%s4464_s3 + $0xa0] sm:$0xff] %vm78_vm0, %v1586_v28  ;;  %v1591_v4 = vadd.f32 %v3042_v49, %v1523_v53  ;;  %vm1026_vm2 = vweird.f32 %v3522_v51  ;;  %vm1076_vm3 = vweird.f32 %v3545_v39  ;;  %1761 = vrsqrt.f32 %v3586_v59  ;;  %v4633_v51 = vld [vmem:[#allocation32_spill] sm:$0xff] }
 0x186   :  { %v3591_v63 = vpop.eup %1755  ;;  %v1522_v23 = vmul.f32 %v3015_v18, %v1454_v62  ;;  %v1022_v25 = vmul.f32 %v1754_v33, %v1021_v40  ;;  %vm1027_vm4 = vweird.f32 %v1754_v33  ;;  %1763 = vrsqrt.f32 %v3588_v0  ;;  %v568_v60 = vpop.xlane.xlu0 %567  ;;  %v3693_v62 = vld [vmem:[%s4462_s1] ss:$0 sm:$0xff] }
 0x187   :  { %1655 = vst.msk [vmem:[%s4464_s3 + $0xc8] sm:$0xff] %vm78_vm0, %v1591_v4  ;;  %v1071_v3 = vmul.f32 %v3591_v63, %v3545_v39  ;;  %vm1066_vm5 = vweird.f32 %v3559_v52  ;;  %v3614_v21 = vadd.f32 1e-05, %v691_v36  ;;  %v695_v46 = vmul.f32 %v571_v13, %v2304_v34  ;;  %vm1028_vm9 = vmor %vm1026_vm2, %vm1027_vm4  ;;  %v4635_v40 = vld [vmem:[#allocation34_spill] sm:$0xff] }
 0x188   :  { %v3604_v5 = vpop.eup %1757  ;;  %v1590_v20 = vadd.f32 %v3042_v49, %v1522_v23  ;;  %v1023_v54 = vmul.f32 0.5, %v1022_v25  ;;  %vm1056_vm6 = vweird.f32 %v3568_v44  ;;  %v3624_v11 = vadd.f32 1e-05, %v696_v32 }
 0x189   :  { %v3608_v43 = vpop.eup %1759  ;;  %v1072_v41 = vmul.f32 %v3591_v63, %v1071_v3  ;;  %v1061_v37 = vmul.f32 %v3604_v5, %v3559_v52  ;;  %vm1077_vm7 = vweird.f32 %v3591_v63  ;;  %1765 = vrsqrt.f32 %v3614_v21  ;;  %v592_v3 = vpop.xlane.xlu2 %591 }
 0x18a   :  { %1654 = vst.msk [vmem:[%s4464_s3 + $0xc0] sm:$0xff] %vm78_vm0, %v1590_v20  ;;  %v1024_v50 = vsub.f32 1.5, %v1023_v54  ;;  %v1051_v30 = vmul.f32 %v3608_v43, %v3568_v44  ;;  %vm1067_vm8 = vweird.f32 %v3604_v5  ;;  %1767 = vrsqrt.f32 %v3624_v11  ;;  %vm1078_vm13 = vmor %vm1076_vm3, %vm1077_vm7  ;;  %v3711_v20 = vld [vmem:[%s4463_s2] ss:$0 sm:$0xff] }
 0x18b   :  { %v1073_v8 = vmul.f32 0.5, %v1072_v41  ;;  %v1062_v48 = vmul.f32 %v3604_v5, %v1061_v37  ;;  %v3634_v29 = vpop.eup %1761  ;;  %vm1057_vm10 = vweird.f32 %v3608_v43  ;;  %v3640_v22 = vadd.f32 1e-05, %v695_v46  ;;  %vm1068_vm15 = vmor %vm1066_vm5, %vm1067_vm8 }
 0x18c   :  { %v1025_v14 = vmul.f32 %v1754_v33, %v1024_v50  ;;  %v1052_v35 = vmul.f32 %v3608_v43, %v1051_v30  ;;  %v3642_v58 = vpop.eup %1763  ;;  %v1101_v19 = vmul.f32 %v3634_v29, %v3586_v59  ;;  %vm1106_vm11 = vweird.f32 %v3586_v59  ;;  %vm1058_vm1 = vmor %vm1056_vm6, %vm1057_vm10 }
 0x18d   :  { %v1074_v42 = vsub.f32 1.5, %v1073_v8  ;;  %v1063_v61 = vmul.f32 0.5, %v1062_v48  ;;  %v3648_v2 = vmul.f32 %v568_v60, %v2304_v34  ;;  %v1091_v27 = vmul.f32 %v3642_v58, %v3588_v0 }
 0x18e   :  { %v1029_v16 = vsel %vm1028_vm9, %v1754_v33, %v1025_v14  ;;  %v1053_v55 = vmul.f32 0.5, %v1052_v35  ;;  %vm1096_vm12 = vweird.f32 %v3588_v0  ;;  %v1102_v12 = vmul.f32 %v3634_v29, %v1101_v19  ;;  %v3688_v52 = vpop.xlane.xlu0 %576  ;;  %v4637_v14 = vld [vmem:[#allocation36_spill] sm:$0xff]  ;;  %v589_v19 = vpop.xlane.xlu1 %588 }
 0x18f   :  { %v1453_v26 = vmul.f32 %v1029_v16, %v4633_v51  ;;  %v1075_v31 = vmul.f32 %v3591_v63, %v1074_v42  ;;  %v1064_v10 = vsub.f32 1.5, %v1063_v61  ;;  %vm1107_vm14 = vweird.f32 %v3634_v29  ;;  %v3664_v56 = vpop.eup %1765 }
 0x190   :  { %v1054_v24 = vsub.f32 1.5, %v1053_v55  ;;  %1769 = vrsqrt.f32 %v3640_v22  ;;  %v1092_v39 = vmul.f32 %v3642_v58, %v1091_v27  ;;  %v3670_v45 = vpop.eup %1767  ;;  %v1103_v33 = vmul.f32 0.5, %v1102_v12  ;;  %vm1108_vm6 = vmor %vm1106_vm11, %vm1107_vm14 }
 0x191   :  { %v1521_v6 = vmul.f32 %v3015_v18, %v1453_v26  ;;  %v1079_v57 = vsel %vm1078_vm13, %v3591_v63, %v1075_v31  ;;  %v1065_v7 = vmul.f32 %v3604_v5, %v1064_v10  ;;  %v1081_v18 = vmul.f32 %v3664_v56, %v3614_v21  ;;  %v4636_v63 = vld [vmem:[#allocation35_spill] sm:$0xff] }
 0x192   :  { %v1458_v47 = vmul.f32 %v1079_v57, %v4634_v15  ;;  %v1055_v38 = vmul.f32 %v3608_v43, %v1054_v24  ;;  %v1093_v1 = vmul.f32 0.5, %v1092_v39  ;;  %vm1097_vm2 = vweird.f32 %v3642_v58 }
 0x193   :  { %v1589_v28 = vadd.f32 %v3042_v49, %v1521_v6  ;;  %v1069_v53 = vsel %vm1068_vm15, %v3604_v5, %v1065_v7  ;;  %vm1086_vm3 = vweird.f32 %v3614_v21  ;;  %v1104_v44 = vsub.f32 1.5, %v1103_v33  ;;  %vm1098_vm7 = vmor %vm1096_vm12, %vm1097_vm2  ;;  %v4639_v7 = vld [vmem:[#allocation38_spill] sm:$0xff]  ;;  %v601_v33 = vpop.xlane.xlu2 %600 }
 0x194   :  { %v1526_v49 = vmul.f32 %v3693_v62, %v1458_v47  ;;  %v1457_v4 = vmul.f32 %v1069_v53, %v4635_v40  ;;  %v1059_v36 = vsel %vm1058_vm1, %v3608_v43, %v1055_v38  ;;  %v1094_v25 = vsub.f32 1.5, %v1093_v1  ;;  %v4640_v1 = vld [vmem:[#allocation39_spill] sm:$0xff] }
 0x195   :  { %1653 = vst.msk [vmem:[%s4464_s3 + $0xb8] sm:$0xff] %vm78_vm0, %v1589_v28  ;;  %v1456_v23 = vmul.f32 %v1059_v36, %v4636_v63  ;;  %v1082_v32 = vmul.f32 %v3664_v56, %v1081_v18  ;;  %v1131_v13 = vmul.f32 %v3670_v45, %v3624_v11  ;;  %v1105_v41 = vmul.f32 %v3634_v29, %v1104_v44  ;;  %v4641_v44 = vld [vmem:[#allocation40_spill] sm:$0xff] }
 0x196   :  { %v3706_v5 = vpop.eup %1769  ;;  %v1594_v54 = vadd.f32 %v3711_v20, %v1526_v49  ;;  %v1525_v43 = vmul.f32 %v3693_v62, %v1457_v4  ;;  %vm1087_vm4 = vweird.f32 %v3664_v56  ;;  %vm1136_vm5 = vweird.f32 %v3624_v11 }
 0x197   :  { %v1524_v37 = vmul.f32 %v3693_v62, %v1456_v23  ;;  %v1095_v46 = vmul.f32 %v3642_v58, %v1094_v25  ;;  %v1083_v60 = vmul.f32 0.5, %v1082_v32  ;;  %v1132_v50 = vmul.f32 %v3670_v45, %v1131_v13  ;;  %vm1088_vm10 = vmor %vm1086_vm3, %vm1087_vm4  ;;  %v598_v32 = vpop.xlane.xlu1 %597 }
 0x198   :  { %1658 = vst.msk [vmem:[%s4464_s3 + $0xe0] sm:$0xff] %vm78_vm0, %v1594_v54  ;;  %v1593_v30 = vadd.f32 %v3711_v20, %v1525_v43  ;;  %v1109_v8 = vsel %vm1108_vm6, %v3634_v29, %v1105_v41  ;;  %vm1137_vm8 = vweird.f32 %v3670_v45  ;;  %v1121_v59 = vmul.f32 %v3706_v5, %v3640_v22  ;;  %v4638_v29 = vld [vmem:[#allocation37_spill] sm:$0xff] }
 0x199   :  { %v1592_v48 = vadd.f32 %v3711_v20, %v1524_v37  ;;  %v1461_v35 = vmul.f32 %v1109_v8, %v4637_v14  ;;  %v1099_v42 = vsel %vm1098_vm7, %v3642_v58, %v1095_v46  ;;  %v1084_v61 = vsub.f32 1.5, %v1083_v60  ;;  %vm1138_vm12 = vmor %vm1136_vm5, %vm1137_vm8 }
 0x19a   :  { %1657 = vst.msk [vmem:[%s4464_s3 + $0xd8] sm:$0xff] %vm78_vm0, %v1593_v30  ;;  %v1460_v0 = vmul.f32 %v1099_v42, %v4638_v29  ;;  %v1133_v16 = vmul.f32 0.5, %v1132_v50  ;;  %v1122_v55 = vmul.f32 %v3706_v5, %v1121_v59  ;;  %vm1126_vm9 = vweird.f32 %v3640_v22 }
 0x19b   :  { %1656 = vst.msk [vmem:[%s4464_s3 + $0xd0] sm:$0xff] %vm78_vm0, %v1592_v48  ;;  %v1529_v58 = vmul.f32 %v3693_v62, %v1461_v35  ;;  %v1085_v51 = vmul.f32 %v3664_v56, %v1084_v61  ;;  %v3755_v26 = vadd.f32 1e-05, %v3648_v2  ;;  %v699_v31 = vmul.f32 %v3629_v9, %v2304_v34  ;;  %v586_v9 = vpop.xlane.xlu0 %585  ;;  %v3850_v35 = vpop.xlane.xlu2 %609 }
 0x19c   :  { %v1528_v10 = vmul.f32 %v3693_v62, %v1460_v0  ;;  %v1134_v27 = vsub.f32 1.5, %v1133_v16  ;;  %v1123_v24 = vmul.f32 0.5, %v1122_v55  ;;  %v698_v12 = vmul.f32 %v3662_v17, %v2304_v34 }
 0x19d   :  { %v1597_v6 = vadd.f32 %v3711_v20, %v1529_v58  ;;  %v1089_v2 = vsel %vm1088_vm10, %v3664_v56, %v1085_v51  ;;  %vm1127_vm11 = vweird.f32 %v3706_v5  ;;  %1771 = vrsqrt.f32 %v3755_v26 }
 0x19e   :  { %v1596_v57 = vadd.f32 %v3711_v20, %v1528_v10  ;;  %v1459_v39 = vmul.f32 %v1089_v2, %v4639_v7  ;;  %v1135_v21 = vmul.f32 %v3670_v45, %v1134_v27  ;;  %v1124_v15 = vsub.f32 1.5, %v1123_v24  ;;  %vm1128_vm13 = vmor %vm1126_vm9, %vm1127_vm11 }
 0x19f   :  { %1661 = vst.msk [vmem:[%s4464_s3 + $0xf8] sm:$0xff] %vm78_vm0, %v1597_v6  ;;  %v3781_v17 = vadd.f32 1e-05, %v699_v31  ;;  %v3783_v56 = vadd.f32 1e-05, %v698_v12  ;;  %v697_v47 = vmul.f32 %v3688_v52, %v2304_v34  ;;  %v702_v38 = vmul.f32 %v592_v3, %v2304_v34  ;;  %v3884_v7 = vpop.xlane.xlu1 %606 }
 0x1a0   :  { %1660 = vst.msk [vmem:[%s4464_s3 + $0xf0] sm:$0xff] %vm78_vm0, %v1596_v57  ;;  %v1527_v18 = vmul.f32 %v3693_v62, %v1459_v39  ;;  %v1139_v11 = vsel %vm1138_vm12, %v3670_v45, %v1135_v21  ;;  %v1125_v28 = vmul.f32 %v3706_v5, %v1124_v15  ;;  %v701_v53 = vmul.f32 %v589_v19, %v2304_v34 }
 0x1a1   :  { %v1464_v49 = vmul.f32 %v1139_v11, %v4640_v1  ;;  %1773 = vrsqrt.f32 %v3781_v17  ;;  %v3805_v45 = vadd.f32 1e-05, %v697_v47  ;;  %v3809_v23 = vadd.f32 1e-05, %v702_v38 }
 0x1a2   :  { %v1595_v52 = vadd.f32 %v3711_v20, %v1527_v18  ;;  %v1129_v40 = vsel %vm1128_vm13, %v3706_v5, %v1125_v28  ;;  %1775 = vrsqrt.f32 %v3783_v56  ;;  %v3811_v25 = vadd.f32 1e-05, %v701_v53 }
 0x1a3   :  { %v1772_v4 = vpop.eup %1771  ;;  %v1532_v36 = vmul.f32 %v3693_v62, %v1464_v49  ;;  %v1463_v63 = vmul.f32 %v1129_v40, %v4641_v44  ;;  %1777 = vrsqrt.f32 %v3805_v45  ;;  %v700_v54 = vmul.f32 %v586_v9, %v2304_v34  ;;  %v595_v60 = vpop.xlane.xlu0 %594 }
 0x1a4   :  { %1659 = vst.msk [vmem:[%s4464_s3 + $0xe8] sm:$0xff] %vm78_vm0, %v1595_v52  ;;  %v1111_v22 = vmul.f32 %v1772_v4, %v3755_v26  ;;  %1779 = vrsqrt.f32 %v3809_v23  ;;  %vm1116_vm14 = vweird.f32 %v3755_v26  ;;  %v705_v37 = vmul.f32 %v601_v33, %v2304_v34  ;;  %v4642_v26 = vld [vmem:[#allocation41_spill] sm:$0xff] }
 0x1a5   :  { %v1600_v13 = vadd.f32 %v3711_v20, %v1532_v36  ;;  %v1531_v3 = vmul.f32 %v3693_v62, %v1463_v63  ;;  %1781 = vrsqrt.f32 %v3811_v25  ;;  %v704_v46 = vmul.f32 %v598_v32, %v2304_v34  ;;  %v4643_v36 = vld [vmem:[#allocation4_spill] sm:$0xff] }
 0x1a6   :  { %v1112_v5 = vmul.f32 %v1772_v4, %v1111_v22  ;;  %vm1166_vm15 = vweird.f32 %v3781_v17  ;;  %v3839_v59 = vadd.f32 1e-05, %v700_v54  ;;  %vm1117_vm1 = vweird.f32 %v1772_v4 }
 0x1a7   :  { %v3824_v43 = vpop.eup %1773  ;;  %1664 = vst.msk [vmem:[%s4464_s3 + $0x110] sm:$0xff] %vm78_vm0, %v1600_v13  ;;  %v1599_v41 = vadd.f32 %v3711_v20, %v1531_v3  ;;  %vm1156_vm2 = vweird.f32 %v3783_v56  ;;  %v3848_v14 = vadd.f32 1e-05, %v705_v37  ;;  %v3857_v0 = vmul.f32 %v595_v60, %v2304_v34  ;;  %vm1118_vm6 = vmor %vm1116_vm14, %vm1117_vm1  ;;  %v3914_v13 = vpop.xlane.xlu2 %618 }
 0x1a8   :  { %v3834_v50 = vpop.eup %1775  ;;  %v1113_v30 = vmul.f32 0.5, %v1112_v5  ;;  %v1161_v8 = vmul.f32 %v3824_v43, %v3781_v17  ;;  %1783 = vrsqrt.f32 %v3839_v59  ;;  %vm1167_vm3 = vweird.f32 %v3824_v43 }
 0x1a9   :  { %1663 = vst.msk [vmem:[%s4464_s3 + $0x108] sm:$0xff] %vm78_vm0, %v1599_v41  ;;  %v1151_v48 = vmul.f32 %v3834_v50, %v3783_v56  ;;  %v3852_v42 = vpop.eup %1777  ;;  %vm1146_vm4 = vweird.f32 %v3805_v45  ;;  %v3866_v58 = vadd.f32 1e-05, %v704_v46  ;;  %vm1196_vm5 = vweird.f32 %v3809_v23  ;;  %vm1168_vm11 = vmor %vm1166_vm15, %vm1167_vm3  ;;  %v4644_v56 = vld [vmem:[#allocation5_spill] sm:$0xff] }
 0x1aa   :  { %v1114_v61 = vsub.f32 1.5, %v1113_v30  ;;  %v1162_v29 = vmul.f32 %v3824_v43, %v1161_v8  ;;  %v3859_v16 = vpop.eup %1779  ;;  %v1141_v19 = vmul.f32 %v3852_v42, %v3805_v45  ;;  %1785 = vrsqrt.f32 %v3848_v14 }
 0x1ab   :  { %v1152_v55 = vmul.f32 %v3834_v50, %v1151_v48  ;;  %v3868_v51 = vpop.eup %1781  ;;  %v1191_v27 = vmul.f32 %v3859_v16, %v3809_v23  ;;  %vm1157_vm7 = vweird.f32 %v3834_v50  ;;  %vm1147_vm8 = vweird.f32 %v3852_v42  ;;  %v604_v32 = vpop.xlane.xlu0 %603 }
 0x1ac   :  { %v1115_v31 = vmul.f32 %v1772_v4, %v1114_v61  ;;  %v1163_v10 = vmul.f32 0.5, %v1162_v29  ;;  %v1142_v12 = vmul.f32 %v3852_v42, %v1141_v19  ;;  %v1181_v6 = vmul.f32 %v3868_v51, %v3811_v25  ;;  %vm1158_vm12 = vmor %vm1156_vm2, %vm1157_vm7 }
 0x1ad   :  { %v1153_v24 = vmul.f32 0.5, %v1152_v55  ;;  %v1192_v57 = vmul.f32 %v3859_v16, %v1191_v27  ;;  %vm1186_vm9 = vweird.f32 %v3811_v25  ;;  %vm1197_vm10 = vweird.f32 %v3859_v16  ;;  %vm1148_vm15 = vmor %vm1146_vm4, %vm1147_vm8  ;;  %v616_v27 = vpop.xlane.xlu1 %615 }
 0x1ae   :  { %v1119_v2 = vsel %vm1118_vm6, %v1772_v4, %v1115_v31  ;;  %v1164_v9 = vsub.f32 1.5, %v1163_v10  ;;  %v1143_v15 = vmul.f32 0.5, %v1142_v12  ;;  %v1182_v47 = vmul.f32 %v3868_v51, %v1181_v6  ;;  %v3888_v38 = vpop.eup %1783  ;;  %vm1198_vm1 = vmor %vm1196_vm5, %vm1197_vm10 }
 0x1af   :  { %v1462_v39 = vmul.f32 %v1119_v2, %v4642_v26  ;;  %v1154_v21 = vsub.f32 1.5, %v1153_v24  ;;  %v1193_v18 = vmul.f32 0.5, %v1192_v57  ;;  %1787 = vrsqrt.f32 %v3866_v58  ;;  %v4647_v24 = vld [vmem:[#allocation8_spill] sm:$0xff] }
 0x1b0   :  { %v1165_v33 = vmul.f32 %v3824_v43, %v1164_v9  ;;  %v1144_v53 = vsub.f32 1.5, %v1143_v15  ;;  %v1183_v1 = vmul.f32 0.5, %v1182_v47  ;;  %v3899_v49 = vpop.eup %1785  ;;  %vm1187_vm13 = vweird.f32 %v3868_v51 }
 0x1b1   :  { %v1530_v11 = vmul.f32 %v3693_v62, %v1462_v39  ;;  %v1155_v28 = vmul.f32 %v3834_v50, %v1154_v21  ;;  %v1194_v40 = vsub.f32 1.5, %v1193_v18  ;;  %v1171_v17 = vmul.f32 %v3888_v38, %v3839_v59  ;;  %vm1188_vm4 = vmor %vm1186_vm9, %vm1187_vm13 }
 0x1b2   :  { %v1169_v52 = vsel %vm1168_vm11, %v3824_v43, %v1165_v33  ;;  %v1145_v22 = vmul.f32 %v3852_v42, %v1144_v53  ;;  %vm1176_vm14 = vweird.f32 %v3839_v59  ;;  %v1184_v54 = vsub.f32 1.5, %v1183_v1  ;;  %v628_v53 = vpop.xlane.xlu2 %627  ;;  %v4648_v1 = vld [vmem:[#allocation3_spill] sm:$0xff] }
 0x1b3   :  { %v1598_v4 = vadd.f32 %v3711_v20, %v1530_v11  ;;  %v1467_v44 = vmul.f32 %v1169_v52, %v4643_v36  ;;  %v1159_v63 = vsel %vm1158_vm12, %v3834_v50, %v1155_v28  ;;  %v1195_v5 = vmul.f32 %v3859_v16, %v1194_v40  ;;  %v4645_v50 = vld [vmem:[#allocation2_spill] sm:$0xff]  ;;  %v613_v28 = vpop.xlane.xlu0 %612 }
 0x1b4   :  { %v1466_v3 = vmul.f32 %v1159_v63, %v4644_v56  ;;  %v1172_v43 = vmul.f32 %v3888_v38, %v1171_v17  ;;  %v1149_v37 = vsel %vm1148_vm15, %v3852_v42, %v1145_v22  ;;  %vm1177_vm2 = vweird.f32 %v3888_v38  ;;  %v4646_v42 = vld [vmem:[#allocation7_spill] sm:$0xff]  ;;  %v4649_v36 = vld [vmem:[#allocation10_spill] sm:$0xff] }
 0x1b5   :  { %1662 = vst.msk [vmem:[%s4464_s3 + $0x100] sm:$0xff] %vm78_vm0, %v1598_v4  ;;  %v1535_v41 = vmul.f32 %v3693_v62, %v1467_v44  ;;  %v1221_v45 = vmul.f32 %v3899_v49, %v3848_v14  ;;  %vm1226_vm3 = vweird.f32 %v3848_v14  ;;  %v3937_v46 = vpop.eup %1787  ;;  %v1465_v30 = vmul.f32 %v1149_v37, %v4645_v50  ;;  %vm1178_vm6 = vmor %vm1176_vm14, %vm1177_vm2 }
 0x1b6   :  { %v1534_v60 = vmul.f32 %v3693_v62, %v1466_v3  ;;  %v1199_v8 = vsel %vm1198_vm1, %v3859_v16, %v1195_v5  ;;  %v1185_v48 = vmul.f32 %v3868_v51, %v1184_v54  ;;  %v1173_v29 = vmul.f32 0.5, %v1172_v43  ;;  %v625_v5 = vpop.xlane.xlu1 %624  ;;  %v4650_v54 = vld [vmem:[#allocation11_spill] sm:$0xff] }
 0x1b7   :  { %v1603_v23 = vadd.f32 %v3711_v20, %v1535_v41  ;;  %v1470_v61 = vmul.f32 %v1199_v8, %v4646_v42  ;;  %v1222_v55 = vmul.f32 %v3899_v49, %v1221_v45  ;;  %v1533_v31 = vmul.f32 %v3693_v62, %v1465_v30 }
 0x1b8   :  { %v1602_v19 = vadd.f32 %v3711_v20, %v1534_v60  ;;  %v1189_v16 = vsel %vm1188_vm4, %v3868_v51, %v1185_v48  ;;  %v1211_v10 = vmul.f32 %v3937_v46, %v3866_v58  ;;  %v1174_v6 = vsub.f32 1.5, %v1173_v29 }
 0x1b9   :  { %1667 = vst.msk [vmem:[%s4464_s3 + $0x128] sm:$0xff] %vm78_vm0, %v1603_v23  ;;  %v1538_v25 = vmul.f32 %v3693_v62, %v1470_v61  ;;  %v1469_v12 = vmul.f32 %v1189_v16, %v4647_v24  ;;  %v1223_v2 = vmul.f32 0.5, %v1222_v55  ;;  %v1601_v51 = vadd.f32 %v3711_v20, %v1533_v31 }
 0x1ba   :  { %1666 = vst.msk [vmem:[%s4464_s3 + $0x120] sm:$0xff] %vm78_vm0, %v1602_v19  ;;  %vm1227_vm5 = vweird.f32 %v3899_v49  ;;  %v1212_v9 = vmul.f32 %v3937_v46, %v1211_v10  ;;  %v3969_v57 = vadd.f32 1e-05, %v3857_v0  ;;  %v1175_v21 = vmul.f32 %v3888_v38, %v1174_v6  ;;  %v637_v55 = vpop.xlane.xlu2 %636 }
 0x1bb   :  { %v1606_v26 = vadd.f32 %v3711_v20, %v1538_v25  ;;  %v1537_v39 = vmul.f32 %v3693_v62, %v1469_v12  ;;  %v1224_v15 = vsub.f32 1.5, %v1223_v2  ;;  %1665 = vst.msk [vmem:[%s4464_s3 + $0x118] sm:$0xff] %vm78_vm0, %v1601_v51  ;;  %vm1217_vm7 = vweird.f32 %v3937_v46  ;;  %vm1228_vm8 = vmor %vm1226_vm3, %vm1227_vm5  ;;  %v622_v29 = vpop.xlane.xlu0 %621 }
 0x1bc   :  { %v1213_v47 = vmul.f32 0.5, %v1212_v9  ;;  %1789 = vrsqrt.f32 %v3969_v57  ;;  %v708_v0 = vmul.f32 %v3850_v35, %v2304_v34  ;;  %v1179_v18 = vsel %vm1178_vm6, %v3888_v38, %v1175_v21 }
 0x1bd   :  { %1670 = vst.msk [vmem:[%s4464_s3 + $0x140] sm:$0xff] %vm78_vm0, %v1606_v26  ;;  %v1605_v33 = vadd.f32 %v3711_v20, %v1537_v39  ;;  %v1225_v59 = vmul.f32 %v3899_v49, %v1224_v15  ;;  %v707_v11 = vmul.f32 %v3884_v7, %v2304_v34  ;;  %v1468_v52 = vmul.f32 %v1179_v18, %v4648_v1 }
 0x1be   :  { %v1214_v35 = vsub.f32 1.5, %v1213_v47  ;;  %v4000_v40 = vadd.f32 1e-05, %v708_v0  ;;  %v706_v17 = vmul.f32 %v604_v32, %v2304_v34  ;;  %vm1216_vm9 = vweird.f32 %v3866_v58 }
 0x1bf   :  { %1669 = vst.msk [vmem:[%s4464_s3 + $0x138] sm:$0xff] %vm78_vm0, %v1605_v33  ;;  %v1229_v7 = vsel %vm1228_vm8, %v3899_v49, %v1225_v59  ;;  %v4009_v38 = vadd.f32 1e-05, %v707_v11  ;;  %v711_v14 = vmul.f32 %v3914_v13, %v2304_v34  ;;  %v1536_v4 = vmul.f32 %v3693_v62, %v1468_v52  ;;  %vm1218_vm10 = vmor %vm1216_vm9, %vm1217_vm7  ;;  %v4094_v33 = vpop.xlane.xlu1 %633 }
 0x1c0   :  { %v1473_v44 = vmul.f32 %v1229_v7, %v4649_v36  ;;  %v1215_v63 = vmul.f32 %v3937_v46, %v1214_v35  ;;  %1791 = vrsqrt.f32 %v4000_v40  ;;  %v4020_v49 = vadd.f32 1e-05, %v706_v17 }
 0x1c1   :  { %1793 = vrsqrt.f32 %v4009_v38  ;;  %v710_v58 = vmul.f32 %v616_v27, %v2304_v34  ;;  %v1604_v32 = vadd.f32 %v3711_v20, %v1536_v4  ;;  %v4026_v3 = vadd.f32 1e-05, %v711_v14 }
 0x1c2   :  { %v1790_v22 = vpop.eup %1789  ;;  %v1541_v13 = vmul.f32 %v3693_v62, %v1473_v44  ;;  %v1219_v56 = vsel %vm1218_vm10, %v3937_v46, %v1215_v63  ;;  %1795 = vrsqrt.f32 %v4020_v49  ;;  %v709_v50 = vmul.f32 %v613_v28, %v2304_v34 }
 0x1c3   :  { %v1472_v43 = vmul.f32 %v1219_v56, %v4650_v54  ;;  %v1201_v41 = vmul.f32 %v1790_v22, %v3969_v57  ;;  %1668 = vst.msk [vmem:[%s4464_s3 + $0x130] sm:$0xff] %vm78_vm0, %v1604_v32  ;;  %1797 = vrsqrt.f32 %v4026_v3  ;;  %v4038_v60 = vadd.f32 1e-05, %v710_v58  ;;  %v4652_v32 = vld [vmem:[#allocation13_spill] sm:$0xff] }
 0x1c4   :  { %v1609_v37 = vadd.f32 %v3711_v20, %v1541_v13  ;;  %vm1206_vm11 = vweird.f32 %v3969_v57  ;;  %v714_v8 = vmul.f32 %v628_v53, %v2304_v34  ;;  %vm1256_vm12 = vweird.f32 %v4000_v40  ;;  %v4651_v53 = vld [vmem:[#allocation6_spill] sm:$0xff] }
 0x1c5   :  { %v1540_v45 = vmul.f32 %v3693_v62, %v1472_v43  ;;  %v1202_v46 = vmul.f32 %v1790_v22, %v1201_v41  ;;  %vm1207_vm13 = vweird.f32 %v1790_v22  ;;  %vm1246_vm14 = vweird.f32 %v4009_v38  ;;  %v4653_v43 = vld [vmem:[#allocation14_spill] sm:$0xff] }
 0x1c6   :  { %v4041_v30 = vpop.eup %1791  ;;  %1673 = vst.msk [vmem:[%s4464_s3 + $0x158] sm:$0xff] %vm78_vm0, %v1609_v37  ;;  %1799 = vrsqrt.f32 %v4038_v60  ;;  %v713_v31 = vmul.f32 %v625_v5, %v2304_v34  ;;  %v4067_v25 = vadd.f32 1e-05, %v709_v50  ;;  %v4069_v24 = vadd.f32 1e-05, %v714_v8  ;;  %vm1208_vm3 = vmor %vm1206_vm11, %vm1207_vm13 }
 0x1c7   :  { %v4049_v48 = vpop.eup %1793  ;;  %v1608_v23 = vadd.f32 %v3711_v20, %v1540_v45  ;;  %v1203_v42 = vmul.f32 0.5, %v1202_v46  ;;  %v1251_v61 = vmul.f32 %v4041_v30, %v4000_v40  ;;  %vm1236_vm15 = vweird.f32 %v4020_v49 }
 0x1c8   :  { %v1241_v19 = vmul.f32 %v4049_v48, %v4009_v38  ;;  %v4060_v16 = vpop.eup %1795  ;;  %v4078_v51 = vmul.f32 %v622_v29, %v2304_v34  ;;  %v4081_v9 = vmul.f32 %v637_v55, %v2304_v34  ;;  %vm1257_vm1 = vweird.f32 %v4041_v30 }
 0x1c9   :  { %1672 = vst.msk [vmem:[%s4464_s3 + $0x150] sm:$0xff] %vm78_vm0, %v1608_v23  ;;  %v1204_v10 = vsub.f32 1.5, %v1203_v42  ;;  %v1252_v27 = vmul.f32 %v4041_v30, %v1251_v61  ;;  %v4071_v12 = vpop.eup %1797  ;;  %v1231_v2 = vmul.f32 %v4060_v16, %v4020_v49  ;;  %vm1286_vm2 = vweird.f32 %v4026_v3  ;;  %vm1258_vm7 = vmor %vm1256_vm12, %vm1257_vm1 }
 0x1ca   :  { %v1242_v6 = vmul.f32 %v4049_v48, %v1241_v19  ;;  %v1281_v21 = vmul.f32 %v4071_v12, %v4026_v3  ;;  %1801 = vrsqrt.f32 %v4067_v25  ;;  %v4092_v0 = vadd.f32 1e-05, %v713_v31  ;;  %v4655_v19 = vld [vmem:[#allocation16_spill] sm:$0xff] }
 0x1cb   :  { %v1205_v26 = vmul.f32 %v1790_v22, %v1204_v10  ;;  %v1253_v39 = vmul.f32 0.5, %v1252_v27  ;;  %v1232_v47 = vmul.f32 %v4060_v16, %v1231_v2  ;;  %1803 = vrsqrt.f32 %v4069_v24  ;;  %v643_v10 = vpop.xlane.xlu1 %642 }
 0x1cc   :  { %v1243_v15 = vmul.f32 0.5, %v1242_v6  ;;  %v1282_v11 = vmul.f32 %v4071_v12, %v1281_v21  ;;  %v4098_v28 = vpop.eup %1799  ;;  %vm1247_vm4 = vweird.f32 %v4049_v48  ;;  %vm1237_vm5 = vweird.f32 %v4060_v16 }
 0x1cd   :  { %v1209_v18 = vsel %vm1208_vm3, %v1790_v22, %v1205_v26  ;;  %v1254_v59 = vsub.f32 1.5, %v1253_v39  ;;  %v1233_v52 = vmul.f32 0.5, %v1232_v47  ;;  %v1271_v7 = vmul.f32 %v4098_v28, %v4038_v60  ;;  %vm1248_vm8 = vmor %vm1246_vm14, %vm1247_vm4 }
 0x1ce   :  { %v1471_v57 = vmul.f32 %v1209_v18, %v4651_v53  ;;  %v1244_v1 = vsub.f32 1.5, %v1243_v15  ;;  %v1283_v17 = vmul.f32 0.5, %v1282_v11  ;;  %vm1276_vm6 = vweird.f32 %v4038_v60  ;;  %vm1238_vm10 = vmor %vm1236_vm15, %vm1237_vm5 }
 0x1cf   :  { %v1255_v35 = vmul.f32 %v4041_v30, %v1254_v59  ;;  %v1234_v36 = vsub.f32 1.5, %v1233_v52  ;;  %1805 = vrsqrt.f32 %v4092_v0  ;;  %vm1287_vm9 = vweird.f32 %v4071_v12  ;;  %v4656_v59 = vld [vmem:[#allocation17_spill] sm:$0xff] }
 0x1d0   :  { %v1539_v14 = vmul.f32 %v3693_v62, %v1471_v57  ;;  %v1245_v4 = vmul.f32 %v4049_v48, %v1244_v1  ;;  %v1284_v63 = vsub.f32 1.5, %v1283_v17  ;;  %v1272_v58 = vmul.f32 %v4098_v28, %v1271_v7  ;;  %v4119_v22 = vpop.eup %1801  ;;  %vm1288_vm12 = vmor %vm1286_vm2, %vm1287_vm9  ;;  %v646_v1 = vpop.xlane.xlu2 %645 }
 0x1d1   :  { %v1259_v44 = vsel %vm1258_vm7, %v4041_v30, %v1255_v35  ;;  %v1235_v5 = vmul.f32 %v4060_v16, %v1234_v36  ;;  %v4125_v54 = vpop.eup %1803  ;;  %v1261_v45 = vmul.f32 %v4119_v22, %v4067_v25  ;;  %vm1266_vm11 = vweird.f32 %v4067_v25  ;;  %v631_v30 = vpop.xlane.xlu0 %630 }
 0x1d2   :  { %v1607_v40 = vadd.f32 %v3711_v20, %v1539_v14  ;;  %v1476_v13 = vmul.f32 %v1259_v44, %v4652_v32  ;;  %v1249_v56 = vsel %vm1248_vm8, %v4049_v48, %v1245_v4  ;;  %v1285_v41 = vmul.f32 %v4071_v12, %v1284_v63  ;;  %v4654_v48 = vld [vmem:[#allocation9_spill] sm:$0xff] }
 0x1d3   :  { %v1475_v38 = vmul.f32 %v1249_v56, %v4653_v43  ;;  %v1273_v37 = vmul.f32 0.5, %v1272_v58  ;;  %v1239_v50 = vsel %vm1238_vm10, %v4060_v16, %v1235_v5  ;;  %vm1277_vm13 = vweird.f32 %v4098_v28  ;;  %v4658_v58 = vld [vmem:[#allocation19_spill] sm:$0xff]  ;;  %v652_v5 = vpop.xlane.xlu1 %651 }
 0x1d4   :  { %1671 = vst.msk [vmem:[%s4464_s3 + $0x148] sm:$0xff] %vm78_vm0, %v1607_v40  ;;  %v1544_v46 = vmul.f32 %v3693_v62, %v1476_v13  ;;  %v1311_v49 = vmul.f32 %v4125_v54, %v4069_v24  ;;  %v1474_v23 = vmul.f32 %v1239_v50, %v4654_v48  ;;  %v1289_v42 = vsel %vm1288_vm12, %v4071_v12, %v1285_v41  ;;  %vm1278_vm15 = vmor %vm1276_vm6, %vm1277_vm13 }
 0x1d5   :  { %v1543_v8 = vmul.f32 %v3693_v62, %v1475_v38  ;;  %v1274_v61 = vsub.f32 1.5, %v1273_v37  ;;  %v4152_v29 = vpop.eup %1805  ;;  %v1479_v3 = vmul.f32 %v1289_v42, %v4655_v19  ;;  %v1262_v31 = vmul.f32 %v4119_v22, %v1261_v45 }
 0x1d6   :  { %v1612_v55 = vadd.f32 %v3711_v20, %v1544_v46  ;;  %v1312_v16 = vmul.f32 %v4125_v54, %v1311_v49  ;;  %v1542_v6 = vmul.f32 %v3693_v62, %v1474_v23  ;;  %vm1267_vm14 = vweird.f32 %v4119_v22 }
 0x1d7   :  { %v1611_v27 = vadd.f32 %v3711_v20, %v1543_v8  ;;  %v1275_v2 = vmul.f32 %v4098_v28, %v1274_v61  ;;  %v1547_v12 = vmul.f32 %v3693_v62, %v1479_v3  ;;  %v1263_v26 = vmul.f32 0.5, %v1262_v31  ;;  %vm1268_vm3 = vmor %vm1266_vm11, %vm1267_vm14  ;;  %v4659_v8 = vld [vmem:[#allocation20_spill] sm:$0xff] }
 0x1d8   :  { %1676 = vst.msk [vmem:[%s4464_s3 + $0x170] sm:$0xff] %vm78_vm0, %v1612_v55  ;;  %v1313_v39 = vmul.f32 0.5, %v1312_v16  ;;  %v1301_v21 = vmul.f32 %v4152_v29, %v4092_v0  ;;  %v1610_v15 = vadd.f32 %v3711_v20, %v1542_v6  ;;  %vm1317_vm1 = vweird.f32 %v4125_v54  ;;  %v655_v61 = vpop.xlane.xlu2 %654 }
 0x1d9   :  { %1675 = vst.msk [vmem:[%s4464_s3 + $0x168] sm:$0xff] %vm78_vm0, %v1611_v27  ;;  %v1279_v47 = vsel %vm1278_vm15, %v4098_v28, %v1275_v2  ;;  %v4181_v18 = vadd.f32 1e-05, %v4078_v51  ;;  %v1615_v60 = vadd.f32 %v3711_v20, %v1547_v12  ;;  %v1264_v53 = vsub.f32 1.5, %v1263_v26  ;;  %v640_v44 = vpop.xlane.xlu0 %639 }
 0x1da   :  { %v1478_v11 = vmul.f32 %v1279_v47, %v4656_v59  ;;  %v1314_v57 = vsub.f32 1.5, %v1313_v39  ;;  %1674 = vst.msk [vmem:[%s4464_s3 + $0x160] sm:$0xff] %vm78_vm0, %v1610_v15  ;;  %vm1316_vm2 = vweird.f32 %v4069_v24  ;;  %v1302_v28 = vmul.f32 %v4152_v29, %v1301_v21 }
 0x1db   :  { %1807 = vrsqrt.f32 %v4181_v18  ;;  %v4193_v51 = vadd.f32 1e-05, %v4081_v9  ;;  %1679 = vst.msk [vmem:[%s4464_s3 + $0x188] sm:$0xff] %vm78_vm0, %v1615_v60  ;;  %v1265_v35 = vmul.f32 %v4119_v22, %v1264_v53  ;;  %v716_v9 = vmul.f32 %v4094_v33, %v2304_v34  ;;  %vm1318_vm4 = vmor %vm1316_vm2, %vm1317_vm1  ;;  %v4657_v33 = vld [vmem:[#allocation12_spill] sm:$0xff] }
 0x1dc   :  { %v1546_v52 = vmul.f32 %v3693_v62, %v1478_v11  ;;  %v1315_v24 = vmul.f32 %v4125_v54, %v1314_v57  ;;  %v1303_v17 = vmul.f32 0.5, %v1302_v28  ;;  %vm1307_vm5 = vweird.f32 %v4152_v29  ;;  %v661_v11 = vpop.xlane.xlu1 %660 }
 0x1dd   :  { %1809 = vrsqrt.f32 %v4193_v51  ;;  %v715_v7 = vmul.f32 %v631_v30, %v2304_v34  ;;  %v1269_v25 = vsel %vm1268_vm3, %v4119_v22, %v1265_v35  ;;  %v4216_v36 = vadd.f32 1e-05, %v716_v9 }
 0x1de   :  { %v1614_v14 = vadd.f32 %v3711_v20, %v1546_v52  ;;  %v1319_v4 = vsel %vm1318_vm4, %v4125_v54, %v1315_v24  ;;  %v1477_v63 = vmul.f32 %v1269_v25, %v4657_v33  ;;  %v1304_v32 = vsub.f32 1.5, %v1303_v17 }
 0x1df   :  { %v1482_v40 = vmul.f32 %v1319_v4, %v4658_v58  ;;  %v4220_v13 = vadd.f32 1e-05, %v715_v7  ;;  %vm1306_vm6 = vweird.f32 %v4092_v0  ;;  %1811 = vrsqrt.f32 %v4216_v36 }
 0x1e0   :  { %1678 = vst.msk [vmem:[%s4464_s3 + $0x180] sm:$0xff] %vm78_vm0, %v1614_v14  ;;  %v720_v22 = vmul.f32 %v646_v1, %v2304_v34  ;;  %v719_v56 = vmul.f32 %v643_v10, %v2304_v34  ;;  %v1545_v43 = vmul.f32 %v3693_v62, %v1477_v63  ;;  %v1305_v41 = vmul.f32 %v4152_v29, %v1304_v32  ;;  %vm1308_vm7 = vmor %vm1306_vm6, %vm1307_vm5 }
 0x1e1   :  { %v4230_v54 = vpop.eup %1807  ;;  %v1550_v38 = vmul.f32 %v3693_v62, %v1482_v40  ;;  %1813 = vrsqrt.f32 %v4220_v13  ;;  %vm1296_vm8 = vweird.f32 %v4181_v18  ;;  %vm1346_vm9 = vweird.f32 %v4193_v51  ;;  %v649_v21 = vpop.xlane.xlu0 %648 }
 0x1e2   :  { %v1291_v0 = vmul.f32 %v4230_v54, %v4181_v18  ;;  %v4240_v37 = vadd.f32 1e-05, %v720_v22  ;;  %v1613_v46 = vadd.f32 %v3711_v20, %v1545_v43  ;;  %v1309_v49 = vsel %vm1308_vm7, %v4152_v29, %v1305_v41  ;;  %v4660_v18 = vld [vmem:[#allocation15_spill] sm:$0xff]  ;;  %v4661_v22 = vld [vmem:[#allocation22_spill] sm:$0xff] }
 0x1e3   :  { %v4242_v45 = vpop.eup %1809  ;;  %v1618_v50 = vadd.f32 %v3711_v20, %v1550_v38  ;;  %v4247_v30 = vadd.f32 1e-05, %v719_v56  ;;  %v1481_v48 = vmul.f32 %v1309_v49, %v4659_v8  ;;  %v718_v29 = vmul.f32 %v640_v44, %v2304_v34 }
 0x1e4   :  { %v1292_v23 = vmul.f32 %v4230_v54, %v1291_v0  ;;  %v1341_v42 = vmul.f32 %v4242_v45, %v4193_v51  ;;  %1677 = vst.msk [vmem:[%s4464_s3 + $0x178] sm:$0xff] %vm78_vm0, %v1613_v46  ;;  %1815 = vrsqrt.f32 %v4240_v37  ;;  %vm1297_vm10 = vweird.f32 %v4230_v54 }
 0x1e5   :  { %v4261_v55 = vpop.eup %1811  ;;  %1682 = vst.msk [vmem:[%s4464_s3 + $0x1a0] sm:$0xff] %vm78_vm0, %v1618_v50  ;;  %v1549_v19 = vmul.f32 %v3693_v62, %v1481_v48  ;;  %1817 = vrsqrt.f32 %v4247_v30  ;;  %vm1336_vm11 = vweird.f32 %v4216_v36  ;;  %v4276_v27 = vadd.f32 1e-05, %v718_v29  ;;  %vm1298_vm1 = vmor %vm1296_vm8, %vm1297_vm10 }
 0x1e6   :  { %v1293_v3 = vmul.f32 0.5, %v1292_v23  ;;  %v1342_v31 = vmul.f32 %v4242_v45, %v1341_v42  ;;  %v1331_v10 = vmul.f32 %v4261_v55, %v4216_v36  ;;  %v723_v6 = vmul.f32 %v655_v61, %v2304_v34  ;;  %v4662_v36 = vld [vmem:[#allocation23_spill] sm:$0xff]  ;;  %v4663_v42 = vld [vmem:[#allocation18_spill] sm:$0xff] }
 0x1e7   :  { %v4270_v16 = vpop.eup %1813  ;;  %v1617_v2 = vadd.f32 %v3711_v20, %v1549_v19  ;;  %vm1326_vm12 = vweird.f32 %v4220_v13  ;;  %vm1347_vm13 = vweird.f32 %v4242_v45  ;;  %vm1337_vm14 = vweird.f32 %v4261_v55 }
 0x1e8   :  { %v1294_v12 = vsub.f32 1.5, %v1293_v3  ;;  %v1343_v26 = vmul.f32 0.5, %v1342_v31  ;;  %v1321_v39 = vmul.f32 %v4270_v16, %v4220_v13  ;;  %v1332_v15 = vmul.f32 %v4261_v55, %v1331_v10  ;;  %vm1348_vm3 = vmor %vm1346_vm9, %vm1347_vm13 }
 0x1e9   :  { %1819 = vrsqrt.f32 %v4276_v27  ;;  %1681 = vst.msk [vmem:[%s4464_s3 + $0x198] sm:$0xff] %vm78_vm0, %v1617_v2  ;;  %vm1327_vm15 = vweird.f32 %v4270_v16  ;;  %v4300_v1 = vadd.f32 1e-05, %v723_v6  ;;  %v722_v28 = vmul.f32 %v652_v5, %v2304_v34  ;;  %vm1338_vm6 = vmor %vm1336_vm11, %vm1337_vm14 }
 0x1ea   :  { %v1295_v47 = vmul.f32 %v4230_v54, %v1294_v12  ;;  %v1344_v60 = vsub.f32 1.5, %v1343_v26  ;;  %v1322_v59 = vmul.f32 %v4270_v16, %v1321_v39  ;;  %v4294_v53 = vpop.eup %1815  ;;  %v1333_v57 = vmul.f32 0.5, %v1332_v15  ;;  %vm1328_vm8 = vmor %vm1326_vm12, %vm1327_vm15  ;;  %v4665_v15 = vld [vmem:[#allocation26_spill] sm:$0xff] }
 0x1eb   :  { %v721_v52 = vmul.f32 %v649_v21, %v2304_v34  ;;  %v1818_v35 = vpop.eup %1817  ;;  %v1371_v7 = vmul.f32 %v4294_v53, %v4240_v37  ;;  %vm1376_vm2 = vweird.f32 %v4240_v37  ;;  %vm1366_vm4 = vweird.f32 %v4247_v30  ;;  %v4664_v37 = vld [vmem:[#allocation25_spill] sm:$0xff] }
 0x1ec   :  { %v1299_v24 = vsel %vm1298_vm1, %v4230_v54, %v1295_v47  ;;  %v1345_v9 = vmul.f32 %v4242_v45, %v1344_v60  ;;  %v1323_v17 = vmul.f32 0.5, %v1322_v59  ;;  %v1334_v25 = vsub.f32 1.5, %v1333_v57 }
 0x1ed   :  { %v1480_v14 = vmul.f32 %v1299_v24, %v4660_v18  ;;  %v1361_v4 = vmul.f32 %v1818_v35, %v4247_v30  ;;  %v725_v44 = vmul.f32 %v661_v11, %v2304_v34  ;;  %v1372_v58 = vmul.f32 %v4294_v53, %v1371_v7  ;;  %v658_v30 = vpop.xlane.xlu0 %657 }
 0x1ee   :  { %v1349_v33 = vsel %vm1348_vm3, %v4242_v45, %v1345_v9  ;;  %v1324_v63 = vsub.f32 1.5, %v1323_v17  ;;  %vm1377_vm5 = vweird.f32 %v4294_v53  ;;  %v1335_v56 = vmul.f32 %v4261_v55, %v1334_v25 }
 0x1ef   :  { %v1820_v40 = vpop.eup %1819  ;;  %v1548_v32 = vmul.f32 %v3693_v62, %v1480_v14  ;;  %v1485_v51 = vmul.f32 %v1349_v33, %v4661_v22  ;;  %v1362_v5 = vmul.f32 %v1818_v35, %v1361_v4  ;;  %v1373_v43 = vmul.f32 0.5, %v1372_v58  ;;  %vm1378_vm10 = vmor %vm1376_vm2, %vm1377_vm5 }
 0x1f0   :  { %v1325_v54 = vmul.f32 %v4270_v16, %v1324_v63  ;;  %vm1367_vm7 = vweird.f32 %v1818_v35  ;;  %v1351_v38 = vmul.f32 %v1820_v40, %v4276_v27  ;;  %v1339_v45 = vsel %vm1338_vm6, %v4261_v55, %v1335_v56 }
 0x1f1   :  { %v1616_v41 = vadd.f32 %v3711_v20, %v1548_v32  ;;  %v1553_v0 = vmul.f32 %v3693_v62, %v1485_v51  ;;  %v1363_v46 = vmul.f32 0.5, %v1362_v5  ;;  %v1484_v50 = vmul.f32 %v1339_v45, %v4662_v36  ;;  %vm1368_vm11 = vmor %vm1366_vm4, %vm1367_vm7 }
 0x1f2   :  { %v1329_v49 = vsel %vm1328_vm8, %v4270_v16, %v1325_v54  ;;  %v1374_v8 = vsub.f32 1.5, %v1373_v43  ;;  %v1352_v48 = vmul.f32 %v1820_v40, %v1351_v38  ;;  %1821 = vrsqrt.f32 %v4300_v1 }
 0x1f3   :  { %1680 = vst.msk [vmem:[%s4464_s3 + $0x190] sm:$0xff] %vm78_vm0, %v1616_v41  ;;  %v1621_v23 = vadd.f32 %v3711_v20, %v1553_v0  ;;  %v1483_v61 = vmul.f32 %v1329_v49, %v4663_v42  ;;  %v1364_v29 = vsub.f32 1.5, %v1363_v46  ;;  %v1552_v13 = vmul.f32 %v3693_v62, %v1484_v50  ;;  %v4667_v46 = vld [vmem:[#allocation28_spill] sm:$0xff] }
 0x1f4   :  { %v1375_v55 = vmul.f32 %v4294_v53, %v1374_v8  ;;  %v1353_v19 = vmul.f32 0.5, %v1352_v48  ;;  %vm1357_vm9 = vweird.f32 %v1820_v40  ;;  %v4356_v16 = vadd.f32 1e-05, %v722_v28  ;;  %v4394_v28 = vld [vmem:[%s4463_s2] ss:$0 sm:$0xff] }
 0x1f5   :  { %1685 = vst.msk [vmem:[%s4464_s3 + $0x1b8] sm:$0xff] %vm78_vm0, %v1621_v23  ;;  %v1551_v3 = vmul.f32 %v3693_v62, %v1483_v61  ;;  %v1365_v31 = vmul.f32 %v1818_v35, %v1364_v29  ;;  %v4358_v10 = vadd.f32 1e-05, %v721_v52  ;;  %v1620_v6 = vadd.f32 %v3711_v20, %v1552_v13 }
 0x1f6   :  { %v1379_v2 = vsel %vm1378_vm10, %v4294_v53, %v1375_v55  ;;  %v1354_v12 = vsub.f32 1.5, %v1353_v19  ;;  %v4365_v62 = vadd.f32 1e-05, %v725_v44  ;;  %1823 = vrsqrt.f32 %v4356_v16  ;;  %v4668_v55 = vld [vmem:[#allocation42_spill] sm:$0xff] }
 0x1f7   :  { %v1619_v26 = vadd.f32 %v3711_v20, %v1551_v3  ;;  %v1488_v39 = vmul.f32 %v1379_v2, %v4664_v37  ;;  %v1369_v21 = vsel %vm1368_vm11, %v1818_v35, %v1365_v31  ;;  %1684 = vst.msk [vmem:[%s4464_s3 + $0x1b0] sm:$0xff] %vm78_vm0, %v1620_v6  ;;  %vm1356_vm12 = vweird.f32 %v4276_v27  ;;  %v4384_v20 = vld [vmem:[%s4462_s1] ss:$0 sm:$0xff]  ;;  %v4666_v35 = vld [vmem:[#allocation21_spill] sm:$0xff]  ;;  %v4669_v31 = vld [vmem:[#allocation24_spill] sm:$0xff] }
 0x1f8   :  { %v1487_v47 = vmul.f32 %v1369_v21, %v4665_v15  ;;  %v1355_v60 = vmul.f32 %v1820_v40, %v1354_v12  ;;  %1825 = vrsqrt.f32 %v4358_v10  ;;  %v1822_v59 = vpop.eup %1821  ;;  %vm1358_vm13 = vmor %vm1356_vm12, %vm1357_vm9  ;;  %v724_v9 = vmul.f32 %v658_v30, %v2304_v34  ;;  %v4670_v12 = vld [vmem:[#allocation43_spill] sm:$0xff] }
 0x1f9   :  { %1683 = vst.msk [vmem:[%s4464_s3 + $0x1a8] sm:$0xff] %vm78_vm0, %v1619_v26  ;;  %v1556_v11 = vmul.f32 %v4384_v20, %v1488_v39  ;;  %1827 = vrsqrt.f32 %v4365_v62  ;;  %v1401_v57 = vmul.f32 %v1822_v59, %v4300_v1  ;;  %vm1407_vm14 = vweird.f32 %v1822_v59 }
 0x1fa   :  { %v1555_v27 = vmul.f32 %v4384_v20, %v1487_v47  ;;  %v1359_v53 = vsel %vm1358_vm13, %v1820_v40, %v1355_v60  ;;  %v4405_v25 = vadd.f32 1e-05, %v724_v9  ;;  %vm1406_vm15 = vweird.f32 %v4300_v1 }
 0x1fb   :  { %v1624_v52 = vadd.f32 %v4394_v28, %v1556_v11  ;;  %v1486_v24 = vmul.f32 %v1359_v53, %v4666_v35  ;;  %v1402_v7 = vmul.f32 %v1822_v59, %v1401_v57  ;;  %vm1408_vm1 = vmor %vm1406_vm15, %vm1407_vm14  ;;  %vm1396_vm3 = vweird.f32 %v4356_v16 }
 0x1fc   :  { %v1623_v17 = vadd.f32 %v4394_v28, %v1555_v27  ;;  %v1824_v18 = vpop.eup %1823  ;;  %1829 = vrsqrt.f32 %v4405_v25  ;;  %vm1386_vm7 = vweird.f32 %v4358_v10  ;;  %vm1426_vm9 = vweird.f32 %v4365_v62 }
 0x1fd   :  { %1688 = vst.msk [vmem:[%s4464_s3 + $0x1d0] sm:$0xff] %vm78_vm0, %v1624_v52  ;;  %v1554_v14 = vmul.f32 %v4384_v20, %v1486_v24  ;;  %v1403_v34 = vmul.f32 0.5, %v1402_v7  ;;  %v1391_v44 = vmul.f32 %v1824_v18, %v4356_v16  ;;  %vm1397_vm2 = vweird.f32 %v1824_v18 }
 0x1fe   :  { %v1826_v4 = vpop.eup %1825  ;;  %1687 = vst.msk [vmem:[%s4464_s3 + $0x1c8] sm:$0xff] %vm78_vm0, %v1623_v17  ;;  %vm1398_vm6 = vmor %vm1396_vm3, %vm1397_vm2  ;;  %vm1416_vm12 = vweird.f32 %v4405_v25 }
 0x1ff   :  { %v1828_v33 = vpop.eup %1827  ;;  %v1622_v63 = vadd.f32 %v4394_v28, %v1554_v14  ;;  %v1381_v58 = vmul.f32 %v1826_v4, %v4358_v10  ;;  %v1404_v40 = vsub.f32 1.5, %v1403_v34  ;;  %v1392_v32 = vmul.f32 %v1824_v18, %v1391_v44 }
 0x200   :  { %v1421_v22 = vmul.f32 %v1828_v33, %v4365_v62  ;;  %vm1387_vm4 = vweird.f32 %v1826_v4  ;;  %vm1427_vm5 = vweird.f32 %v1828_v33 }
 0x201   :  { %1686 = vst.msk [vmem:[%s4464_s3 + $0x1c0] sm:$0xff] %vm78_vm0, %v1622_v63  ;;  %v1382_v51 = vmul.f32 %v1826_v4, %v1381_v58  ;;  %v1405_v56 = vmul.f32 %v1822_v59, %v1404_v40  ;;  %v1393_v5 = vmul.f32 0.5, %v1392_v32  ;;  %vm1388_vm8 = vmor %vm1386_vm7, %vm1387_vm4 }
 0x202   :  { %v1422_v54 = vmul.f32 %v1828_v33, %v1421_v22  ;;  %v1830_v45 = vpop.eup %1829  ;;  %vm1428_vm10 = vmor %vm1426_vm9, %vm1427_vm5 }
 0x203   :  { %v1383_v43 = vmul.f32 0.5, %v1382_v51  ;;  %v1409_v38 = vsel %vm1408_vm1, %v1822_v59, %v1405_v56  ;;  %v1394_v41 = vsub.f32 1.5, %v1393_v5  ;;  %v1411_v1 = vmul.f32 %v1830_v45, %v4405_v25  ;;  %v4671_v59 = vld [vmem:[#allocation27_spill] sm:$0xff] }
 0x204   :  { %v1423_v0 = vmul.f32 0.5, %v1422_v54  ;;  %v1491_v36 = vmul.f32 %v1409_v38, %v4667_v46  ;;  %vm1417_vm11 = vweird.f32 %v1830_v45 }
 0x205   :  { %v1384_v50 = vsub.f32 1.5, %v1383_v43  ;;  %v1395_v49 = vmul.f32 %v1824_v18, %v1394_v41  ;;  %v1412_v29 = vmul.f32 %v1830_v45, %v1411_v1  ;;  %vm1418_vm13 = vmor %vm1416_vm12, %vm1417_vm11 }
 0x206   :  { %v1424_v8 = vsub.f32 1.5, %v1423_v0  ;;  %v1559_v48 = vmul.f32 %v4384_v20, %v1491_v36 }
 0x207   :  { %v1385_v23 = vmul.f32 %v1826_v4, %v1384_v50  ;;  %v1399_v42 = vsel %vm1398_vm6, %v1824_v18, %v1395_v49  ;;  %v1413_v2 = vmul.f32 0.5, %v1412_v29 }
 0x208   :  { %v1425_v61 = vmul.f32 %v1828_v33, %v1424_v8  ;;  %v1627_v13 = vadd.f32 %v4394_v28, %v1559_v48  ;;  %v1490_v19 = vmul.f32 %v1399_v42, %v4668_v55 }
 0x209   :  { %v1389_v3 = vsel %vm1388_vm8, %v1826_v4, %v1385_v23  ;;  %v1414_v37 = vsub.f32 1.5, %v1413_v2 }
 0x20a   :  { %v1489_v16 = vmul.f32 %v1389_v3, %v4669_v31  ;;  %v1429_v6 = vsel %vm1428_vm10, %v1828_v33, %v1425_v61  ;;  %1691 = vst.msk [vmem:[%s4464_s3 + $0x1e8] sm:$0xff] %vm78_vm0, %v1627_v13  ;;  %v1558_v10 = vmul.f32 %v4384_v20, %v1490_v19 }
 0x20b   :  { %v1493_v62 = vmul.f32 %v1429_v6, %v4670_v12  ;;  %v1415_v47 = vmul.f32 %v1830_v45, %v1414_v37 }
 0x20c   :  { %v1557_v26 = vmul.f32 %v4384_v20, %v1489_v16  ;;  %v1626_v39 = vadd.f32 %v4394_v28, %v1558_v10 }
 0x20d   :  { %v1561_v21 = vmul.f32 %v4384_v20, %v1493_v62  ;;  %v1419_v30 = vsel %vm1418_vm13, %v1830_v45, %v1415_v47 }
 0x20e   :  { %v1625_v15 = vadd.f32 %v4394_v28, %v1557_v26  ;;  %1690 = vst.msk [vmem:[%s4464_s3 + $0x1e0] sm:$0xff] %vm78_vm0, %v1626_v39  ;;  %v1492_v11 = vmul.f32 %v1419_v30, %v4671_v59 }
 0x20f   :  { %v1629_v60 = vadd.f32 %v4394_v28, %v1561_v21 }
 0x210   :  { %1689 = vst.msk [vmem:[%s4464_s3 + $0x1d8] sm:$0xff] %vm78_vm0, %v1625_v15  ;;  %v1560_v27 = vmul.f32 %v4384_v20, %v1492_v11 }
 0x211   :  { %1693 = vst.msk [vmem:[%s4464_s3 + $0x1f8] sm:$0xff] %vm78_vm0, %v1629_v60 }
 0x212   :  { %v1628_v53 = vadd.f32 %v4394_v28, %v1560_v27 }
 0x214   :  { %1692 = vst.msk [vmem:[%s4464_s3 + $0x1f0] sm:$0xff] %vm78_vm0, %v1628_v53 }

</bundles_post_ra>
